<compile_context>
chip_gen: v6e
topology: v6e:2x2x1
jax: 0.10.0
libtpu: 0.0.40
codegen_flags: <defaults>
</compile_context>

<pallas_src>
import functools
import math

import jax
import jax.numpy as jnp
import numpy as np
from jax.experimental import pallas as pl
from jax.experimental.pallas import tpu as pltpu


# ----------------------------- fused kernel --------------------------------
def _fused_gat_kernel(h_ref, adjb_ref, w1_ref, w2a_ref, b_ref, out_ref,
                      h_state, ht_scr, asrc_scr, adst_scr,
                      *, negative_slope, tile_m):
    l = pl.program_id(0)          # layer index   (outer, sequential)
    t = pl.program_id(1)          # dst-node tile (inner)
    last_layer = pl.num_programs(0) - 1

    def leaky(x):
        return jnp.where(x > 0, x, negative_slope * x)

    # ---- once per layer (t == 0): refresh projections from current features.
    @pl.when(t == 0)
    def _per_layer():
        @pl.when(l == 0)
        def _init():
            h_state[...] = h_ref[...]            # bring input features into state

        h_prev = h_state[...]                    # (N, F) f32

        # h_trans = h @ W1  : bf16 MXU inputs, f32 accumulation
        ht_scr[...] = jnp.dot(
            h_prev.astype(jnp.bfloat16), w1_ref[0],
            preferred_element_type=jnp.float32).astype(jnp.bfloat16)

        # Attention logits with attn folded into W2 (fold done on the host):
        #   alpha_src[j] = h_j . w2a[0],   alpha_dst[i] = h_i . w2a[1]
        w2a = w2a_ref[0]                         # (2, F) f32
        asrc_scr[...] = jax.lax.dot_general(     # (1, N)
            w2a[0:1, :], h_prev, (((1,), (1,)), ((), ())),
            preferred_element_type=jnp.float32)
        adst_scr[...] = jax.lax.dot_general(     # (N, 1)
            h_prev, w2a[1:2, :], (((1,), (1,)), ((), ())),
            preferred_element_type=jnp.float32)

    # ---- per destination-row tile: masked edge softmax + message passing.
    r0 = pl.multiple_of(t * tile_m, tile_m)

    # Additive adjacency bias: 0 on edges, -1e30 on non-edges / padding.
    # exp(-1e30 - row_max) underflows to exactly 0, so no selects are needed
    # on the (tile_m, N) hot path.
    e = leaky(adst_scr[pl.ds(r0, tile_m), :] + asrc_scr[...])      # (T, N)
    e_m = e + adjb_ref[pl.ds(r0, tile_m), :]
    row_max = jnp.max(e_m, axis=-1, keepdims=True)
    row_max = jnp.where(row_max > jnp.float32(-1e29), row_max, 0.0)
    p = jnp.exp(e_m - row_max)                                     # 0 on non-edges
    denom = jnp.sum(p, axis=-1, keepdims=True)
    inv = jnp.where(denom > 0, pl.reciprocal(denom, approx=True), 0.0)
    a = (p * inv).astype(jnp.bfloat16)                             # (T, N)

    # out = a @ h_trans + bias, LeakyReLU   (bf16 MXU inputs, f32 accumulation)
    h_new = jnp.dot(a, ht_scr[...], preferred_element_type=jnp.float32)
    h_act = leaky(h_new + b_ref[0])                                # (T, F)

    out_ref[...] = h_act

    # Feed the next layer (skip the useless state write on the final layer).
    @pl.when(l != last_layer)
    def _carry():
        h_state[pl.ds(r0, tile_m), :] = h_act


# ----------------------------- host wrapper --------------------------------
def _round_up(x, m):
    return ((x + m - 1) // m) * m


def _pad2(x, rows, cols):
    return jnp.pad(x, ((0, rows - x.shape[0]), (0, cols - x.shape[1])))


def ligand_atom_channel(h, adj, layer_params, negative_slope):
    """LigandAtomChannel / IntraChannel forward: all GAT layers in one call."""
    n, in_dim = h.shape
    hidden = layer_params[0]["W1"].shape[1]
    num_layers = len(layer_params)

    # Lane-dense (multiple-of-128) feature dim and node dim; padding is exact.
    f_pad = _round_up(max(in_dim, hidden), 128)
    n_pad = _round_up(n, 128)
    tile_m = max(tm for tm in (512, 256, 128) if n_pad % tm == 0)
    num_tiles = n_pad // tile_m

    w1s, w2as, bs = [], [], []
    for p in layer_params:
        w1 = _pad2(p["W1"].astype(jnp.float32), f_pad, f_pad)
        w2 = _pad2(p["W2"].astype(jnp.float32), f_pad, f_pad)
        attn = _pad2(p["attn"].astype(jnp.float32), 2, f_pad)
        # Fold attn into W2:  alpha_k = h @ (W2 @ attn_k),  k in {src, dst}
        w2a = jnp.einsum("fd,kd->kf", w2, attn)                # (2, f_pad)
        b = _pad2(p["bias"].astype(jnp.float32), 1, f_pad)     # (1, f_pad)
        w1s.append(w1), w2as.append(w2a), bs.append(b)

    w1_all = jnp.stack(w1s).astype(jnp.bfloat16)               # (L, F, F) bf16
    w2a_all = jnp.stack(w2as)                                  # (L, 2, F) f32
    b_all = jnp.stack(bs)                                      # (L, 1, F) f32

    h_pad = _pad2(h.astype(jnp.float32), n_pad, f_pad)
    adj_pad = _pad2(adj.astype(jnp.float32), n_pad, n_pad)
    # Additive softmax bias: 0 for edges, -1e30 for non-edges / padding.
    adj_bias = jnp.where(adj_pad > 0.5, jnp.float32(0.0), jnp.float32(-1e30))

    kernel = functools.partial(_fused_gat_kernel,
                               negative_slope=float(negative_slope),
                               tile_m=tile_m)

    out = pl.pallas_call(
        kernel,
        out_shape=jax.ShapeDtypeStruct((n_pad, f_pad), jnp.float32),
        grid_spec=pltpu.PrefetchScalarGridSpec(
            num_scalar_prefetch=0,
            grid=(num_layers, num_tiles),            # layers outer, tiles inner
            in_specs=[
                pl.BlockSpec((n_pad, f_pad), lambda l, t: (0, 0)),        # h   (resident, DMA once)
                pl.BlockSpec((n_pad, n_pad), lambda l, t: (0, 0)),        # adj bias (resident, DMA once)
                pl.BlockSpec((1, f_pad, f_pad), lambda l, t: (l, 0, 0)),  # W1 per layer
                pl.BlockSpec((1, 2, f_pad), lambda l, t: (l, 0, 0)),      # attn folded into W2
                pl.BlockSpec((1, 1, f_pad), lambda l, t: (l, 0, 0)),      # bias per layer
            ],
            out_specs=pl.BlockSpec((tile_m, f_pad), lambda l, t: (t, 0)),
            scratch_shapes=[
                pltpu.VMEM((n_pad, f_pad), jnp.float32),    # h_state  (layer-to-layer features)
                pltpu.VMEM((n_pad, f_pad), jnp.bfloat16),   # h_trans  (h @ W1 of current layer)
                pltpu.VMEM((1, n_pad), jnp.float32),        # alpha_src (row)
                pltpu.VMEM((n_pad, 1), jnp.float32),        # alpha_dst (col)
            ],
        ),
        compiler_params=pltpu.CompilerParams(
            # Both axes carry a sequential dependence through the VMEM state.
            dimension_semantics=("arbitrary", "arbitrary"),
            vmem_limit_bytes=48 * 1024 * 1024,
        ),
    )(h_pad, adj_bias, w1_all, w2a_all, b_all)

    return out[:n, :hidden]


# ----------------------------- reference (plain JAX, f32) ------------------
def gat_layer_ref(h, adj, params, slope):
    h_trans = h @ params["W1"]
    s = h @ params["W2"]
    alpha_src = s @ params["attn"][0]                # (N,)
    alpha_dst = s @ params["attn"][1]                # (N,)
    e = alpha_dst[:, None] + alpha_src[None, :]      # e[i, j] for edge j -> i
    e = jnp.where(e > 0, e, slope * e)
    mask = adj > 0.5
    e_m = jnp.where(mask, e, -1e30)
    row_max = jnp.max(e_m, axis=-1, keepdims=True)
    row_max = jnp.where(row_max < -1e29, 0.0, row_max)
    p = jnp.where(mask, jnp.exp(e_m - row_max), 0.0)
    denom = jnp.sum(p, axis=-1, keepdims=True)
    a = p * jnp.where(denom > 0, 1.0 / denom, 0.0)
    h_new = a @ h_trans + params["bias"]
    return jnp.where(h_new > 0, h_new, slope * h_new)


# ----------------------------- parameter init ------------------------------
def _xavier_normal(key, shape, fan_in, fan_out):
    std = math.sqrt(2.0 / (fan_in + fan_out))
    return std * jax.random.normal(key, shape, dtype=jnp.float32)


def init_gat_layer(key, in_dim, out_dim):
    k1, k2, k3, k4 = jax.random.split(key, 4)
    return {
        "W1": _xavier_normal(k1, (in_dim, out_dim), in_dim, out_dim),
        "W2": _xavier_normal(k2, (in_dim, out_dim), in_dim, out_dim),
        # W3 exists in the PyTorch module but is never used in its forward.
        "W3": _xavier_normal(k3, (in_dim, out_dim), in_dim, out_dim),
        # PyTorch attn is a (2*out_dim,) vector; stored here as (2, out_dim).
        "attn": _xavier_normal(k4, (2, out_dim), 1, 2 * out_dim),
        "bias": jnp.zeros((1, out_dim), dtype=jnp.float32),
    }


def init_ligand_atom_channel(key, num_layers, in_dim, hidden_dim):
    keys = jax.random.split(key, num_layers)
    layers = [init_gat_layer(keys[0], in_dim, hidden_dim)]
    for i in range(1, num_layers):
        layers.append(init_gat_layer(keys[i], hidden_dim, hidden_dim))
    return layers


if __name__ == "__main__":
    num_layers = 2
    num_nodes = 8
    in_dim = 16
    hidden_dim = 32
    negative_slope = 0.2

    key = jax.random.PRNGKey(0)
    k_h, k_adj, k_params, k_bias = jax.random.split(key, 4)

    # node features
    h = jax.random.normal(k_h, (num_nodes, in_dim), dtype=jnp.float32)

    # random directed graph + self loops (adj[i, j] = edge j -> i)
    adj = (jax.random.uniform(k_adj, (num_nodes, num_nodes)) < 0.4).astype(
        jnp.float32)
    adj = jnp.maximum(adj, jnp.eye(num_nodes, dtype=jnp.float32))

    layer_params = init_ligand_atom_channel(k_params, num_layers, in_dim,
                                            hidden_dim)
    # Non-zero bias so the bias-add path is exercised (the PyTorch module
    # initializes bias to zeros; the forward semantics are unchanged).
    for i, p in enumerate(layer_params):
        p["bias"] = 0.1 * jax.random.normal(
            jax.random.fold_in(k_bias, i), (1, hidden_dim), dtype=jnp.float32)

    out = ligand_atom_channel(h, adj, layer_params, negative_slope)
    out = jax.block_until_ready(out)

    # reference check (pure f32).  The kernel runs its two large matmuls with
    # bf16 MXU inputs (f32 accumulation) and uses the approximate reciprocal
    # for the softmax divide, so compare with a bf16-appropriate tolerance.
    ref = h
    for p in layer_params:
        ref = gat_layer_ref(ref, adj, p, negative_slope)
    np.testing.assert_allclose(np.asarray(out), np.asarray(ref),
                               rtol=5e-2, atol=5e-2)

    print("KERNEL_OK")
</pallas_src>

<mosaic_0001>
module attributes {stable_mosaic.version = 11 : i64} {
  func.func @_fused_gat_kernel(%arg0: i32, %arg1: i32, %arg2: memref<128x128xf32, #tpu.memory_space<vmem>>, %arg3: memref<128x128xf32, #tpu.memory_space<vmem>>, %arg4: memref<1x128x128xbf16, #tpu.memory_space<vmem>>, %arg5: memref<1x2x128xf32, #tpu.memory_space<vmem>>, %arg6: memref<1x1x128xf32, #tpu.memory_space<vmem>>, %arg7: memref<128x128xf32, #tpu.memory_space<vmem>>, %arg8: memref<128x128xf32, #tpu.memory_space<vmem>>, %arg9: memref<128x128xbf16, #tpu.memory_space<vmem>>, %arg10: memref<1x128xf32, #tpu.memory_space<vmem>>, %arg11: memref<128x1xf32, #tpu.memory_space<vmem>>) attributes {dimension_semantics = [#tpu.dimension_semantics<arbitrary>, #tpu.dimension_semantics<arbitrary>], iteration_bounds = array<i64: 2, 1>, scalar_prefetch = 0 : i64, scratch_operands = 4 : i64, tpu.core_type = #tpu.core_type<tc>, window_params = [{pipeline_mode = #tpu.pipeline_mode<synchronous>, transform_indices = @transform_0, window_bounds = array<i64: 128, 128>}, {pipeline_mode = #tpu.pipeline_mode<synchronous>, transform_indices = @transform_1, window_bounds = array<i64: 128, 128>}, {transform_indices = @transform_2, window_bounds = array<i64: 1, 128, 128>}, {transform_indices = @transform_3, window_bounds = array<i64: 1, 2, 128>}, {transform_indices = @transform_4, window_bounds = array<i64: 1, 1, 128>}, {transform_indices = @transform_5, window_bounds = array<i64: 128, 128>}]} {
    %c0_i32 = arith.constant 0 : i32
    %0 = arith.cmpi eq, %arg1, %c0_i32 : i32
    %1 = arith.extui %0 : i1 to i32
    %c0_i32_0 = arith.constant 0 : i32
    %2 = arith.cmpi ne, %1, %c0_i32_0 : i32
    scf.if %2 {
      %c0_i32_22 = arith.constant 0 : i32
      %53 = arith.cmpi eq, %arg0, %c0_i32_22 : i32
      %54 = arith.extui %53 : i1 to i32
      %c0_i32_23 = arith.constant 0 : i32
      %55 = arith.cmpi ne, %54, %c0_i32_23 : i32
      scf.if %55 {
        %c0_41 = arith.constant 0 : index
        %c0_42 = arith.constant 0 : index
        %71 = vector.load %arg2[%c0_41, %c0_42] : memref<128x128xf32, #tpu.memory_space<vmem>>, vector<128x128xf32>
        %c0_43 = arith.constant 0 : index
        %c0_44 = arith.constant 0 : index
        %72 = vector.load %arg8[%c0_43, %c0_44] : memref<128x128xf32, #tpu.memory_space<vmem>>, vector<128x128xf32>
        tpu.vector_store %arg8[%c0_43, %c0_44], %71 {strides = array<i32>} : memref<128x128xf32, #tpu.memory_space<vmem>>, vector<128x128xf32>,
      } else {
      }
      %c0_24 = arith.constant 0 : index
      %c0_25 = arith.constant 0 : index
      %56 = vector.load %arg8[%c0_24, %c0_25] : memref<128x128xf32, #tpu.memory_space<vmem>>, vector<128x128xf32>
      %57 = arith.truncf %56 : vector<128x128xf32> to vector<128x128xbf16>
      %c0_26 = arith.constant 0 : index
      %c0_27 = arith.constant 0 : index
      %c0_28 = arith.constant 0 : index
      %58 = vector.load %arg4[%c0_26, %c0_27, %c0_28] : memref<1x128x128xbf16, #tpu.memory_space<vmem>>, vector<1x128x128xbf16>
      %59 = vector.shape_cast %58 : vector<1x128x128xbf16> to vector<128x128xbf16>
      %cst_29 = arith.constant dense<0.000000e+00> : vector<128x128xf32>
      %60 = tpu.matmul %57, %59, %cst_29 {dimension_numbers = #tpu.dot_dimension_numbers<[1], [0], [0], [1], [0, 0, 1, 1], [], []>} : vector<128x128xbf16>, vector<128x128xbf16>, vector<128x128xf32> -> vector<128x128xf32>
      %61 = arith.truncf %60 : vector<128x128xf32> to vector<128x128xbf16>
      %c0_30 = arith.constant 0 : index
      %c0_31 = arith.constant 0 : index
      %62 = vector.load %arg9[%c0_30, %c0_31] : memref<128x128xbf16, #tpu.memory_space<vmem>>, vector<128x128xbf16>
      tpu.vector_store %arg9[%c0_30, %c0_31], %61 {strides = array<i32>} : memref<128x128xbf16, #tpu.memory_space<vmem>>, vector<128x128xbf16>,
      %c0_32 = arith.constant 0 : index
      %c0_33 = arith.constant 0 : index
      %c0_34 = arith.constant 0 : index
      %63 = vector.load %arg5[%c0_32, %c0_33, %c0_34] : memref<1x2x128xf32, #tpu.memory_space<vmem>>, vector<1x2x128xf32>
      %64 = vector.shape_cast %63 : vector<1x2x128xf32> to vector<2x128xf32>
      %65 = vector.extract_strided_slice %64 {offsets = [0, 0], sizes = [1, 128], strides = [1, 1]} : vector<2x128xf32> to vector<1x128xf32>
      %cst_35 = arith.constant dense<0.000000e+00> : vector<1x128xf32>
      %66 = tpu.matmul %65, %56, %cst_35 {dimension_numbers = #tpu.dot_dimension_numbers<[1], [1], [0], [0], [0, 0, 1, 0], [], []>} : vector<1x128xf32>, vector<128x128xf32>, vector<1x128xf32> -> vector<1x128xf32>
      %c0_36 = arith.constant 0 : index
      %c0_37 = arith.constant 0 : index
      %67 = vector.load %arg10[%c0_36, %c0_37] : memref<1x128xf32, #tpu.memory_space<vmem>>, vector<1x128xf32>
      tpu.vector_store %arg10[%c0_36, %c0_37], %66 {strides = array<i32>} : memref<1x128xf32, #tpu.memory_space<vmem>>, vector<1x128xf32>,
      %68 = vector.extract_strided_slice %64 {offsets = [1, 0], sizes = [1, 128], strides = [1, 1]} : vector<2x128xf32> to vector<1x128xf32>
      %cst_38 = arith.constant dense<0.000000e+00> : vector<128x1xf32>
      %69 = tpu.matmul %56, %68, %cst_38 {dimension_numbers = #tpu.dot_dimension_numbers<[1], [1], [0], [0], [0, 0, 1, 0], [], []>} : vector<128x128xf32>, vector<1x128xf32>, vector<128x1xf32> -> vector<128x1xf32>
      %c0_39 = arith.constant 0 : index
      %c0_40 = arith.constant 0 : index
      %70 = vector.load %arg11[%c0_39, %c0_40] : memref<128x1xf32, #tpu.memory_space<vmem>>, vector<128x1xf32>
      tpu.vector_store %arg11[%c0_39, %c0_40], %69 {strides = array<i32>} : memref<128x1xf32, #tpu.memory_space<vmem>>, vector<128x1xf32>,
    } else {
    }
    %c128_i32 = arith.constant 128 : i32
    %3 = arith.muli %arg1, %c128_i32 : i32
    %4 = tpu.assume_multiple %3, 128 : i32
    %5 = arith.index_cast %4 : i32 to index
    %c0 = arith.constant 0 : index
    %6 = vector.load %arg11[%5, %c0] : memref<128x1xf32, #tpu.memory_space<vmem>>, vector<128x1xf32>
    %c0_1 = arith.constant 0 : index
    %c0_2 = arith.constant 0 : index
    %7 = vector.load %arg10[%c0_1, %c0_2] : memref<1x128xf32, #tpu.memory_space<vmem>>, vector<1x128xf32>
    %8 = vector.broadcast %6 : vector<128x1xf32> to vector<128x128xf32>
    %9 = vector.broadcast %7 : vector<1x128xf32> to vector<128x128xf32>
    %10 = arith.addf %8, %9 : vector<128x128xf32>
    %cst = arith.constant 0.000000e+00 : f32
    %11 = vector.broadcast %cst : f32 to vector<128x128xf32>
    %12 = arith.cmpf ogt, %10, %11 : vector<128x128xf32>
    %cst_3 = arith.constant 2.000000e-01 : f32
    %13 = vector.broadcast %cst_3 : f32 to vector<128x128xf32>
    %14 = arith.mulf %13, %10 : vector<128x128xf32>
    %15 = arith.select %12, %10, %14 : vector<128x128xi1>, vector<128x128xf32>
    %16 = arith.index_cast %4 : i32 to index
    %c0_4 = arith.constant 0 : index
    %17 = vector.load %arg3[%16, %c0_4] : memref<128x128xf32, #tpu.memory_space<vmem>>, vector<128x128xf32>
    %18 = arith.addf %15, %17 : vector<128x128xf32>
    %cst_5 = arith.constant dense<0xFF800000> : vector<128xf32>
    %19 = vector.multi_reduction <maximumf>, %18, %cst_5 [1] : vector<128x128xf32> to vector<128xf32>
    %20 = vector.shape_cast %19 : vector<128xf32> to vector<128x1xf32>
    %cst_6 = arith.constant -1.000000e+29 : f32
    %21 = vector.broadcast %cst_6 : f32 to vector<128x1xf32>
    %22 = arith.cmpf ogt, %20, %21 : vector<128x1xf32>
    %cst_7 = arith.constant 0.000000e+00 : f32
    %23 = vector.broadcast %cst_7 : f32 to vector<128x1xf32>
    %24 = arith.select %22, %20, %23 : vector<128x1xi1>, vector<128x1xf32>
    %25 = vector.broadcast %24 : vector<128x1xf32> to vector<128x128xf32>
    %26 = arith.subf %18, %25 : vector<128x128xf32>
    %27 = math.exp %26 : vector<128x128xf32>
    %cst_8 = arith.constant dense<0.000000e+00> : vector<128xf32>
    %28 = vector.multi_reduction <add>, %27, %cst_8 [1] : vector<128x128xf32> to vector<128xf32>
    %29 = vector.shape_cast %28 : vector<128xf32> to vector<128x1xf32>
    %cst_9 = arith.constant 0.000000e+00 : f32
    %30 = vector.broadcast %cst_9 : f32 to vector<128x1xf32>
    %31 = arith.cmpf ogt, %29, %30 : vector<128x1xf32>
    %32 = tpu.reciprocal %29 {approx = true} : vector<128x1xf32> -> vector<128x1xf32>
    %cst_10 = arith.constant 0.000000e+00 : f32
    %33 = vector.broadcast %cst_10 : f32 to vector<128x1xf32>
    %34 = arith.select %31, %32, %33 : vector<128x1xi1>, vector<128x1xf32>
    %35 = vector.broadcast %34 : vector<128x1xf32> to vector<128x128xf32>
    %36 = arith.mulf %27, %35 : vector<128x128xf32>
    %37 = arith.truncf %36 : vector<128x128xf32> to vector<128x128xbf16>
    %c0_11 = arith.constant 0 : index
    %c0_12 = arith.constant 0 : index
    %38 = vector.load %arg9[%c0_11, %c0_12] : memref<128x128xbf16, #tpu.memory_space<vmem>>, vector<128x128xbf16>
    %cst_13 = arith.constant dense<0.000000e+00> : vector<128x128xf32>
    %39 = tpu.matmul %37, %38, %cst_13 {dimension_numbers = #tpu.dot_dimension_numbers<[1], [0], [0], [1], [0, 0, 1, 1], [], []>} : vector<128x128xbf16>, vector<128x128xbf16>, vector<128x128xf32> -> vector<128x128xf32>
    %c0_14 = arith.constant 0 : index
    %c0_15 = arith.constant 0 : index
    %c0_16 = arith.constant 0 : index
    %40 = vector.load %arg6[%c0_14, %c0_15, %c0_16] : memref<1x1x128xf32, #tpu.memory_space<vmem>>, vector<1x1x128xf32>
    %41 = vector.shape_cast %40 : vector<1x1x128xf32> to vector<1x128xf32>
    %42 = vector.broadcast %41 : vector<1x128xf32> to vector<128x128xf32>
    %43 = arith.addf %39, %42 : vector<128x128xf32>
    %cst_17 = arith.constant 0.000000e+00 : f32
    %44 = vector.broadcast %cst_17 : f32 to vector<128x128xf32>
    %45 = arith.cmpf ogt, %43, %44 : vector<128x128xf32>
    %cst_18 = arith.constant 2.000000e-01 : f32
    %46 = vector.broadcast %cst_18 : f32 to vector<128x128xf32>
    %47 = arith.mulf %46, %43 : vector<128x128xf32>
    %48 = arith.select %45, %43, %47 : vector<128x128xi1>, vector<128x128xf32>
    %c0_19 = arith.constant 0 : index
    %c0_20 = arith.constant 0 : index
    %49 = vector.load %arg7[%c0_19, %c0_20] : memref<128x128xf32, #tpu.memory_space<vmem>>, vector<128x128xf32>
    tpu.vector_store %arg7[%c0_19, %c0_20], %48 {strides = array<i32>} : memref<128x128xf32, #tpu.memory_space<vmem>>, vector<128x128xf32>,
    %c1_i32 = arith.constant 1 : i32
    %50 = arith.cmpi ne, %arg0, %c1_i32 : i32
    %51 = arith.extui %50 : i1 to i32
    %c0_i32_21 = arith.constant 0 : i32
    %52 = arith.cmpi ne, %51, %c0_i32_21 : i32
    scf.if %52 {
      %53 = arith.index_cast %4 : i32 to index
      %c0_22 = arith.constant 0 : index
      %54 = vector.load %arg8[%53, %c0_22] : memref<128x128xf32, #tpu.memory_space<vmem>>, vector<128x128xf32>
      tpu.vector_store %arg8[%53, %c0_22], %48 {strides = array<i32>} : memref<128x128xf32, #tpu.memory_space<vmem>>, vector<128x128xf32>,
    } else {
    }
    return
  }
  func.func @transform_0(%arg0: i32, %arg1: i32) -> (i32, i32) {
    %c0_i32 = arith.constant 0 : i32
    %c0_i32_0 = arith.constant 0 : i32
    %c0_i32_1 = arith.constant 0 : i32
    return %c0_i32, %c0_i32_0 : i32, i32
  }
  func.func @transform_1(%arg0: i32, %arg1: i32) -> (i32, i32) {
    %c0_i32 = arith.constant 0 : i32
    %c0_i32_0 = arith.constant 0 : i32
    %c0_i32_1 = arith.constant 0 : i32
    return %c0_i32, %c0_i32_0 : i32, i32
  }
  func.func @transform_2(%arg0: i32, %arg1: i32) -> (i32, i32, i32) {
    %c0_i32 = arith.constant 0 : i32
    %c0_i32_0 = arith.constant 0 : i32
    %c0_i32_1 = arith.constant 0 : i32
    return %arg0, %c0_i32, %c0_i32_0 : i32, i32, i32
  }
  func.func @transform_3(%arg0: i32, %arg1: i32) -> (i32, i32, i32) {
    %c0_i32 = arith.constant 0 : i32
    %c0_i32_0 = arith.constant 0 : i32
    %c0_i32_1 = arith.constant 0 : i32
    return %arg0, %c0_i32, %c0_i32_0 : i32, i32, i32
  }
  func.func @transform_4(%arg0: i32, %arg1: i32) -> (i32, i32, i32) {
    %c0_i32 = arith.constant 0 : i32
    %c0_i32_0 = arith.constant 0 : i32
    %c0_i32_1 = arith.constant 0 : i32
    return %arg0, %c0_i32, %c0_i32_0 : i32, i32, i32
  }
  func.func @transform_5(%arg0: i32, %arg1: i32) -> (i32, i32) {
    %c0_i32 = arith.constant 0 : i32
    %c0_i32_0 = arith.constant 0 : i32
    return %arg1, %c0_i32 : i32, i32
  }
}

</mosaic_0001>

<bundles_post_ra>
// kernel: tpu_custom_call.1
= control target key start
LH: loop header
LB: loop body
LE: loop exit
PB: predicated region body
PF: predicated region fallthrough
CT: control target
= control target key end

     0   :  { %10 = vsyncpa [#allocation7], 0  ;;  %s2675_s0 = inlined_call_operand.hbm [shape: f32[128,128], index: 0, kind: input, shape index: {}]   ;;  %s2676_s1 = inlined_call_operand.hbm [shape: f32[128,128], index: 1, kind: input, shape index: {}]   ;;  %s2677_s2 = inlined_call_operand.hbm [shape: bf16[2,128,128], index: 2, kind: input, shape index: {}]   ;;  %s2678_s3 = inlined_call_operand.vmem [shape: f32[2,2,128], index: 3, kind: input, shape index: {}]   ;;  %s2679_s4 = inlined_call_operand.vmem [shape: f32[2,1,128], index: 4, kind: input, shape index: {}]   ;;  %s2680_s5 = inlined_call_operand.hbm [shape: f32[128,128], index: 5, kind: output, shape index: {}]  }
   0x1   :  { %11 = vsyncpa [#allocation10], 0 }
   0x2   :  { %12 = vsyncpa [#allocation8], 0  ;;  %s2194_s18 = smov 0   ;;  %s2196_s19 = smov 0  }
   0x3   :  { %s2198_s20 = smov 0   ;;  %s2200_s21 = smov 0  }
   0x4   :  { %s2202_s22 = smov 0   ;;  %s2204_s23 = smov 0  }
   0x5 LB: > { %s2223_s24 = sadd.s32 4294967295, %s2149_s23   ;;  %p86_p0 = scmp.ne.s32.totalorder %s2137_s20, %s2133_s19  ;;  %s2149_s23 = sphi %s2204_s23, %s18_s23   ;;  %s2145_s22 = sphi %s2202_s22, %s2694_s22   ;;  %s2141_s21 = sphi %s2200_s21, %s2693_s21   ;;  %s2137_s20 = sphi %s2198_s20, %s2692_s20   ;;  %s2133_s19 = sphi %s2196_s19, %s2691_s19   ;;  %s2129_s18 = sphi %s2194_s18, %s2690_s18  }
   0x6   : > { %p87_p1 = scmp.eq.s32.totalorder %s2149_s23, 0  ;;  %p92_p2 = scmp.ne.s32.totalorder %s2133_s19, %s2129_s18 }
   0x7   : > { %p2681_p3 = scmp.eq.s32.totalorder %s2223_s24, 0  ;;  %p1545_p4 = scmp.ge.s32.totalorder %s2149_s23, 1 }
   0x8   : > { %p88_p5 = por %p87_p1, %p86_p0  ;;  %p181_p6 = scmp.lt.s32.totalorder %s2149_s23, 3 }
   0x9   : > { %p2234_p7 = por %p2681_p3, %p92_p2  ;;  %s2151_s27 = smov [#allocation6]  }
   0xa   : > { %p2238_p8 = pnand %p1545_p4, %p181_p6  ;;  %s193_s28 = sshll.u32 %s2151_s27, 4  ;;  %s194_s28 = int_to_ptr.vmem [resolvable:$true] %s193_s28 }
   0xb   : > { %p1836_p11 = scmp.lt.s32.totalorder %s2149_s23, 2  ;;  %s1994_s6 = scalar_lea.vmem %s194_s28, 2048 }
   0xc   : > { %p1823_p9 = pneg %p2238_p8  ;;  %p1995_p0 = scmp.ne.s32.totalorder %s194_s28, %s1994_s6 }
   0xd   : > { %p2251_p12 = pnand %p1836_p11, %p88_p5  ;;  %p2002_p4 = scmp.lt.s32.totalorder %s194_s28, %s194_s28 }
   0xe   : > { %p2246_p10 = pnand %p1823_p9, %p2681_p3  ;;  %p2003_p6 = scmp.lt.s32.totalorder %s1994_s6, %s1994_s6 }
  0x10   : > { %p1985_p13 = pneg %p2246_p10  ;;  %p2004_p9 = por %p2003_p6, %p2002_p4 }
  0x12   : > { %p1997_p1 = pnand %p1995_p0, %p1985_p13 }
  0x14   : > { %p1998_p2 = pneg %p1997_p1 }
  0x16   : > { %p2005_p3 = pnand %p2004_p9, %p1998_p2 }
  0x18   : > { %2008 = shalt.err (!%p2005_p3)
}
  0x19   : > { %s2152_s7 = smov 128   ;;  %s2153_s8 = smov 8  }
  0x1a   : > { %1826 = dma.hbm_to_vmem [thread:$0]  (!%p2246_p10), %s2675_s0, 2048, %s194_s28, [#allocation7], %s2152_s7, %s2152_s7, %s2153_s8  }
  0x1b   : > { %s2154_s11 = smov [#allocation9]  }
  0x1c   : > { %s206_s12 = sshll.u32 %s2154_s11, 4  ;;  %s207_s12 = int_to_ptr.vmem [resolvable:$true] %s206_s12 }
  0x1d   : > { %s2020_s13 = scalar_lea.vmem %s207_s12, 2048  ;;  %p2028_p1 = scmp.lt.s32.totalorder %s207_s12, %s207_s12 }
  0x1e   : > { %p2021_p5 = scmp.ne.s32.totalorder %s207_s12, %s2020_s13  ;;  %p2029_p3 = scmp.lt.s32.totalorder %s2020_s13, %s2020_s13 }
  0x20   : > { %p2023_p11 = pnand %p2021_p5, %p1985_p13  ;;  %p2030_p2 = por %p2029_p3, %p2028_p1 }
  0x22   : > { %p2024_p0 = pneg %p2023_p11 }
  0x24   : > { %p2031_p4 = pnand %p2030_p2, %p2024_p0 }
  0x26   : > { %2034 = shalt.err (!%p2031_p4)
}
  0x27   : > { %1829 = dma.hbm_to_vmem [thread:$0]  (!%p2246_p10), %s2676_s1, 2048, %s207_s12, [#allocation10], %s2152_s7, %s2152_s7, %s2153_s8  }
  0x28   : > { %s30_s16 = sadd.s32 1, %s2145_s22  ;;  %s79_s17 = sadd.s32 1, %s2137_s20 }
  0x29   : > { %p32_p13 = scmp.ge.s32.totalorder %s30_s16, 2  ;;  %s220_s18 = sand.u32 1, %s2149_s23  }
  0x2a   : > { %s222_s27 = sand.u32 1, %s2137_s20   ;;  %s1597_s29 = sshll.u32 %s2145_s22, 10 }
  0x2b   : > { %s2696_s16 = smov (%p32_p13, %s30_s16), 0  ;;  %s1549_s28 = sshll.u32 %s222_s27, 6 }
  0x2c   : > { %s76_s6 = ssub.s32 %s2145_s22, %s2696_s16  ;;  %s230_s11 = scalar_lea.hbm %s2677_s2, %s1597_s29 }
  0x2d   : > { %p77_p6 = scmp.eq.s32.totalorder %s76_s6, 0  ;;  %s224_s13 = scalar_lea.vmem [#allocation11], %s1549_s28 }
  0x2e   : > { %s231_s14 = sshll.u32 %s224_s13, 4  ;;  %s221_s8 = scalar_lea.sflag [#allocation7], %s220_s18  ;;  %s232_s14 = int_to_ptr.vmem [resolvable:$true] %s231_s14 }
  0x2f   : > { %s2286_s7 = scalar_select %p77_p6, %s2137_s20, %s79_s17  }
  0x30   : > { %p2037_p10 = pneg %p2251_p12  ;;  %s2048_s12 = scalar_lea.vmem %s232_s14, 1024 }
  0x31   : > { %p2049_p9 = scmp.ne.s32.totalorder %s232_s14, %s2048_s12  ;;  %s2155_s15 = smov [#allocation11]  }
  0x32   : > { %s2053_s27 = sshll.u32 %s2155_s15, 4  ;;  %s2054_s27 = int_to_ptr.vmem [resolvable:$false] %s2053_s27 }
  0x33   : > { %p2051_p5 = pnand %p2049_p9, %p2037_p10  ;;  %s2055_s6 = scalar_lea.vmem %s2054_s27, 2048 }
  0x34   : > { %p2056_p0 = scmp.lt.s32.totalorder %s232_s14, %s2054_s27  ;;  %p2057_p1 = scmp.lt.s32.totalorder %s2055_s6, %s2048_s12 }
  0x35   : > { %p2052_p11 = pneg %p2051_p5 }
  0x36   : > { %p2058_p3 = por %p2057_p1, %p2056_p0 }
  0x38   : > { %p2059_p2 = pnand %p2058_p3, %p2052_p11 }
  0x3a   : > { %2062 = shalt.err (!%p2059_p2)
}
  0x3b   : > { %s2156_s28 = smov 64   ;;  %s2157_s17 = smov 4  }
  0x3c   : > { %1833 = dma.hbm_to_vmem [thread:$0]  (!%p2251_p12), %s230_s11, 1024, %s232_s14, %s221_s8, %s2156_s28, %s2156_s28, %s2157_s17  }
  0x3d   : > { %256 = sbr.rel (%p2238_p8) target bundleno = 967 (0x3c7), region = 40  ;;  %p2686_p4 = scmp.eq.s32.totalorder (!%p2238_p8), %s2223_s24, 0 }
  0x42   : > { %2112 = dma.done.wait (%p2686_p4), [#allocation7], 2048   ;;  %p2687_p13 = pmov %p2686_p4 }
  0x43   : > { %p2688_p6 = pmov %p2686_p4 }
  0x44   : > { %2114 = vsyncadd (%p2687_p13), [#allocation7], 4294965248 }
  0x45   : > { %2116 = dma.done.wait (%p2688_p6), [#allocation10], 2048   ;;  %p2689_p10 = pmov %p2686_p4 }
  0x46   : > { %s266_s30 = sand.u32 1, %s2223_s24   ;;  %s268_s18 = sand.u32 1, %s2133_s19  }
  0x47   : > { %2118 = vsyncadd (%p2689_p10), [#allocation10], 4294965248  ;;  %s1555_s29 = sshll.u32 %s268_s18, 6  ;;  %s267_s26 = scalar_lea.sflag [#allocation7], %s266_s30 }
  0x48   : > { %s2304_s9 = scalar_lea.vmem [#allocation11], %s1555_s29 }
  0x49   : > { %2120 = dma.done.wait (%p2234_p7), %s267_s26, 1024  }
  0x4a   : > { %2122 = vsyncadd (%p2234_p7), %s267_s26, 4294966272  ;;  %p299_p8 = scmp.lt.s32.totalorder %s2141_s21, 1  ;;  %p1557_p12 = scmp.ne.s32.totalorder %s2141_s21, 0 }
  0x4c   : > { %s2312_s10 = scalar_select %p299_p8, %s2141_s21, 1 }
  0x4d   : > { %315 = sbr.rel (%p1557_p12) target bundleno = 91 (0x5b), region = 60 }
  0x4e   : > { %s1556_s11 = sshll.u32 %s2312_s10, 1  ;;  %s305_s8 = scalar_lea.vmem %s2679_s4, %s2312_s10 }
  0x4f   : > { %s2322_s27 = scalar_lea.vmem %s2678_s3, %s1556_s11 }
  0x52   : > { %v316_v0 = vld [vmem:[#allocation6] sm:$0xff]  ;;  %v317_v1 = vld [vmem:[#allocation6 + $0x8] sm:$0xff]  ;;  %v318_v2 = vld [vmem:[#allocation6 + $0x10] sm:$0xff] }
  0x53   : > { %332 = vst [vmem:[#allocation2 + $0x30] sm:$0xff] %v316_v0  ;;  %333 = vst [vmem:[#allocation2] sm:$0xff] %v317_v1  ;;  %v319_v3 = vld [vmem:[#allocation6 + $0x18] sm:$0xff]  ;;  %v320_v4 = vld [vmem:[#allocation6 + $0x20] sm:$0xff] }
  0x54   : > { %334 = vst [vmem:[#allocation2 + $0x58] sm:$0xff] %v318_v2  ;;  %v321_v5 = vld [vmem:[#allocation6 + $0x28] sm:$0xff]  ;;  %335 = vst [vmem:[#allocation2 + $0x18] sm:$0xff] %v319_v3  ;;  %v322_v6 = vld [vmem:[#allocation6 + $0x30] sm:$0xff] }
  0x55   : > { %336 = vst [vmem:[#allocation2 + $0x50] sm:$0xff] %v320_v4  ;;  %337 = vst [vmem:[#allocation2 + $0x68] sm:$0xff] %v321_v5  ;;  %v323_v7 = vld [vmem:[#allocation6 + $0x38] sm:$0xff]  ;;  %v324_v8 = vld [vmem:[#allocation6 + $0x40] sm:$0xff] }
  0x56   : > { %338 = vst [vmem:[#allocation2 + $0x8] sm:$0xff] %v322_v6  ;;  %339 = vst [vmem:[#allocation2 + $0x48] sm:$0xff] %v323_v7  ;;  %v325_v9 = vld [vmem:[#allocation6 + $0x48] sm:$0xff]  ;;  %v326_v10 = vld [vmem:[#allocation6 + $0x50] sm:$0xff] }
  0x57   : > { %340 = vst [vmem:[#allocation2 + $0x40] sm:$0xff] %v324_v8  ;;  %v327_v11 = vld [vmem:[#allocation6 + $0x58] sm:$0xff]  ;;  %341 = vst [vmem:[#allocation2 + $0x20] sm:$0xff] %v325_v9  ;;  %v328_v12 = vld [vmem:[#allocation6 + $0x60] sm:$0xff] }
  0x58   : > { %342 = vst [vmem:[#allocation2 + $0x10] sm:$0xff] %v326_v10  ;;  %343 = vst [vmem:[#allocation2 + $0x38] sm:$0xff] %v327_v11  ;;  %v329_v13 = vld [vmem:[#allocation6 + $0x68] sm:$0xff]  ;;  %v330_v14 = vld [vmem:[#allocation6 + $0x70] sm:$0xff] }
  0x59   : > { %344 = vst [vmem:[#allocation2 + $0x60] sm:$0xff] %v328_v12  ;;  %345 = vst [vmem:[#allocation2 + $0x70] sm:$0xff] %v329_v13  ;;  %v331_v15 = vld [vmem:[#allocation6 + $0x78] sm:$0xff] }
  0x5a   : > { %346 = vst [vmem:[#allocation2 + $0x78] sm:$0xff] %v330_v14  ;;  %347 = vst [vmem:[#allocation2 + $0x28] sm:$0xff] %v331_v15 }
  0x5b PF: > { %v685_v16 = vlaneseq  ;;  %v2158_v17 = vmov 0.0   ;;  %vm2159_vm0 = vmmov 0   ;;  %v2331_v20 = vld [vmem:[%s2322_s27] sm:$0x3]  ;;  %v2336_v22 = vld [vmem:[#allocation2 + $0x58] sm:$0xff]  ;;  %v2338_v24 = vld [vmem:[#allocation2 + $0x30] sm:$0xff] }
  0x5c   : > { %1742 = vmatprep.subr.mxu1 %v2158_v17  ;;  %1774 = vmatprep.mubr.msk.f32.mxu1 %vm2159_vm0, %v2158_v17  ;;  %v2340_v25 = vld [vmem:[#allocation2 + $0x18] sm:$0xff]  ;;  %v2342_v26 = vld [vmem:[#allocation2] sm:$0xff]  ;;  %v2353_v33 = vld [vmem:[#allocation2 + $0x68] sm:$0xff]  ;;  %v2160_v48 = vmov 0   ;;  %vm737_vm1 = vcmask 7168   ;;  %p1592_p7 = scmp.eq.s32.totalorder %s2141_s21, 1 }
  0x5d   : > { %v686_v19 = vshrl.u32 %v685_v16, 7  ;;  %v2356_v34 = vld [vmem:[#allocation2 + $0x50] sm:$0xff]  ;;  %v2363_v38 = vld [vmem:[#allocation2 + $0x48] sm:$0xff]  ;;  %1901 = vset.pattern.permute.xlu0 %v2160_v48  ;;  %1902 = vset.pattern.permute.xlu1 %v2160_v48  ;;  %v1903_v55 = vld [vmem:[%s2304_s9 + $0x38] sm:$0xff]   ;;  %v364_v16 = vpack.c.bf16 %v2342_v26, %v2338_v24 }
  0x5e   : > { %v2366_v39 = vld [vmem:[#allocation2 + $0x8] sm:$0xff]  ;;  %v2373_v43 = vld [vmem:[#allocation2 + $0x20] sm:$0xff]  ;;  %v1904_v56 = vld [vmem:[%s2304_s9 + $0x30] sm:$0xff]   ;;  %1710 = vmatprep.subr.bf16.mxu0 %v1903_v55 }
  0x5f   : > { %v687_v23 = vsub.s32 1, %v686_v19  ;;  %v2370_v41 = vld [vmem:[#allocation2 + $0x38] sm:$0xff]  ;;  %v2376_v44 = vld [vmem:[#allocation2 + $0x40] sm:$0xff]  ;;  %v2379_v45 = vld [vmem:[#allocation2 + $0x10] sm:$0xff]  ;;  %1711 = vmatpush3.bf16.msra.mxu0 %v1903_v55  ;;  %1726 = vmatprep.mubr.bf16.mxu0 %v364_v16 }
  0x60   : > { %v2346_v28 = vld [vmem:[#allocation2 + $0x70] sm:$0xff]  ;;  %v2359_v35 = vld [vmem:[#allocation2 + $0x60] sm:$0xff]  ;;  %1712 = vmatprep.subr.bf16.mxu0 %v1904_v56 }
  0x61   : > { %v2326_v18 = vld [vmem:[#allocation2 + $0x28] sm:$0xff]  ;;  %v2334_v21 = vld [vmem:[#allocation2 + $0x78] sm:$0xff]  ;;  %v688_v27 = vrot.slane %v2331_v20, %v687_v23  ;;  %v365_v23 = vpack.c.bf16 %v2340_v25, %v2336_v22 }
  0x62   : > { %1743 = vmatpush3.xpose.msra.mxu1 %v2326_v18  ;;  %v1905_v57 = vld [vmem:[%s2304_s9 + $0x28] sm:$0xff]   ;;  %v1906_v58 = vld [vmem:[%s2304_s9 + $0x20] sm:$0xff]   ;;  %v1907_v63 = vld [vmem:[%s2304_s9 + $0x18] sm:$0xff]  }
  0x63   : > { %1744 = vmatprep.subr.mxu1 %v2158_v17  ;;  %v691_v29 = vmul.f32 %v688_v27, %v2336_v22  ;;  %v689_v30 = vmul.f32 %v688_v27, %v2338_v24  ;;  %v692_v31 = vmul.f32 %v688_v27, %v2340_v25  ;;  %v690_v32 = vmul.f32 %v688_v27, %v2342_v26  ;;  %v1908_v3 = vld [vmem:[%s2304_s9 + $0x10] sm:$0xff]   ;;  %v1909_v8 = vld [vmem:[%s2304_s9 + $0x8] sm:$0xff]   ;;  %v1910_v12 = vld [vmem:[%s2304_s9] sm:$0xff]  }
  0x64   : > { %v694_v36 = vmul.f32 %v688_v27, %v2353_v33  ;;  %v693_v37 = vmul.f32 %v688_v27, %v2356_v34  ;;  %v696_v40 = vmul.f32 %v688_v27, %v2363_v38  ;;  %v695_v42 = vmul.f32 %v688_v27, %v2366_v39  ;;  %1713 = vmatpush3.bf16.msra.mxu0 %v1904_v56 }
  0x65   : > { %709 = vadd.xlane.f32.xlu1 %v691_v29  ;;  %705 = vadd.xlane.f32.xlu0 %v689_v30  ;;  %v698_v46 = vmul.f32 %v688_v27, %v2373_v43  ;;  %v697_v47 = vmul.f32 %v688_v27, %v2376_v44  ;;  %v700_v49 = vmul.f32 %v688_v27, %v2370_v41 }
  0x66   : > { %1745 = vmatpush3.xpose.msra.mxu1 %v2334_v21  ;;  %v699_v50 = vmul.f32 %v688_v27, %v2379_v45  ;;  %v702_v51 = vmul.f32 %v688_v27, %v2346_v28  ;;  %v701_v52 = vmul.f32 %v688_v27, %v2359_v35  ;;  %v704_v53 = vmul.f32 %v688_v27, %v2326_v18 }
  0x67   : > { %1746 = vmatprep.subr.mxu1 %v2158_v17  ;;  %v703_v54 = vmul.f32 %v688_v27, %v2334_v21  ;;  %1714 = vmatprep.subr.bf16.mxu0 %v1905_v57 }
  0x68   : > { %1715 = vmatpush3.bf16.msra.mxu0 %v1905_v57  ;;  %v926_v57 = vld [vmem:[#allocation9 + $0x10] sm:$0xff] }
  0x69   : > { %711 = vadd.xlane.f32.xlu1 %v692_v31  ;;  %707 = vadd.xlane.f32.xlu0 %v690_v32 }
  0x6a   : > { %1747 = vmatpush3.xpose.msra.mxu1 %v2346_v28  ;;  %1716 = vmatprep.subr.bf16.mxu0 %v1906_v58 }
  0x6b   : > { %1748 = vmatprep.subr.mxu1 %v2158_v17 }
  0x6c   : > { %1717 = vmatpush3.bf16.msra.mxu0 %v1906_v58 }
  0x6d   : > { %715 = vadd.xlane.f32.xlu1 %v694_v36  ;;  %713 = vadd.xlane.f32.xlu0 %v693_v37 }
  0x6e   : > { %1749 = vmatpush3.xpose.msra.mxu1 %v2359_v35  ;;  %1718 = vmatprep.subr.bf16.mxu0 %v1907_v63 }
  0x6f   : > { %1750 = vmatprep.subr.mxu1 %v2158_v17 }
  0x70   : > { %1719 = vmatpush3.bf16.msra.mxu0 %v1907_v63  ;;  %v927_v63 = vld [vmem:[#allocation9 + $0x18] sm:$0xff] }
  0x71   : > { %719 = vadd.xlane.f32.xlu1 %v696_v40  ;;  %717 = vadd.xlane.f32.xlu0 %v695_v42  ;;  %v368_v40 = vpack.c.bf16 %v2373_v43, %v2376_v44  ;;  %v369_v42 = vpack.c.bf16 %v2370_v41, %v2379_v45 }
  0x72   : > { %1751 = vmatpush3.xpose.msra.mxu1 %v2370_v41  ;;  %1720 = vmatprep.subr.bf16.mxu0 %v1908_v3 }
  0x73   : > { %1752 = vmatprep.subr.mxu1 %v2158_v17 }
  0x74   : > { %1721 = vmatpush3.bf16.msra.mxu0 %v1908_v3 }
  0x75   : > { %723 = vadd.xlane.f32.xlu1 %v698_v46  ;;  %721 = vadd.xlane.f32.xlu0 %v697_v47 }
  0x76   : > { %1753 = vmatpush3.xpose.msra.mxu1 %v2379_v45  ;;  %1722 = vmatprep.subr.bf16.mxu0 %v1909_v8 }
  0x77   : > { %1754 = vmatprep.subr.mxu1 %v2158_v17 }
  0x78   : > { %1723 = vmatpush3.bf16.msra.mxu0 %v1909_v8 }
  0x79   : > { %727 = vadd.xlane.f32.xlu1 %v700_v49  ;;  %725 = vadd.xlane.f32.xlu0 %v699_v50  ;;  %v924_v49 = vld [vmem:[#allocation9] sm:$0xff] }
  0x7a   : > { %1755 = vmatpush3.xpose.msra.mxu1 %v2373_v43  ;;  %1724 = vmatprep.subr.bf16.mxu0 %v1910_v12 }
  0x7b   : > { %1756 = vmatprep.subr.mxu1 %v2158_v17 }
  0x7c   : > { %1725 = vmatpush3.bf16.msra.mxu0 %v1910_v12  ;;  %v929_v12 = vld [vmem:[#allocation9 + $0x28] sm:$0xff] }
  0x7d   : > { %731 = vadd.xlane.f32.xlu1 %v702_v51  ;;  %729 = vadd.xlane.f32.xlu0 %v701_v52  ;;  %v925_v51 = vld [vmem:[#allocation9 + $0x8] sm:$0xff] }
  0x7e   : > { %1757 = vmatpush3.xpose.msra.mxu1 %v2376_v44 }
  0x7f   : > { %1758 = vmatprep.subr.mxu1 %v2158_v17  ;;  %1727 = vmatmul.mubr.bf16.vlgmr.msra.gmra.mxu0 %v365_v23  ;;  %v930_v23 = vld [vmem:[#allocation9 + $0x30] sm:$0xff] }
  0x81   : > { %735 = vadd.xlane.f32.xlu1 %v704_v53  ;;  %733 = vadd.xlane.f32.xlu0 %v703_v54 }
  0x82   : > { %1759 = vmatpush3.xpose.msra.mxu1 %v2363_v38 }
  0x83   : > { %1760 = vmatprep.subr.mxu1 %v2158_v17 }
  0x86   : > { %1761 = vmatpush3.xpose.msra.mxu1 %v2366_v39 }
  0x87   : > { %1762 = vmatprep.subr.mxu1 %v2158_v17 }
  0x8a   : > { %1763 = vmatpush3.xpose.msra.mxu1 %v2353_v33 }
  0x8b   : > { %1764 = vmatprep.subr.mxu1 %v2158_v17 }
  0x8e   : > { %1765 = vmatpush3.xpose.msra.mxu1 %v2356_v34 }
  0x8f   : > { %1766 = vmatprep.subr.mxu1 %v2158_v17 }
  0x92   : > { %1767 = vmatpush3.xpose.msra.mxu1 %v2340_v25 }
  0x93   : > { %1768 = vmatprep.subr.mxu1 %v2158_v17 }
  0x96   : > { %1769 = vmatpush3.xpose.msra.mxu1 %v2336_v22  ;;  %v366_v22 = vpack.c.bf16 %v2353_v33, %v2356_v34 }
  0x97   : > { %1770 = vmatprep.subr.mxu1 %v2158_v17 }
  0x98   : > { %1730 = vmatprep.mubr.bf16.mxu0 %v366_v22 }
  0x9a   : > { %1771 = vmatpush3.xpose.msra.mxu1 %v2342_v26  ;;  %v367_v26 = vpack.c.bf16 %v2363_v38, %v2366_v39  ;;  %v370_v38 = vpack.c.bf16 %v2346_v28, %v2359_v35  ;;  %v371_v39 = vpack.c.bf16 %v2326_v18, %v2334_v21 }
  0x9b   : > { %1772 = vmatprep.subr.mxu1 %v2158_v17 }
  0x9c   : > { %1731 = vmatmul.mubr.bf16.gmra.mxu0 %v367_v26 }
  0x9d   : > { %1734 = vmatprep.mubr.bf16.mxu0 %v368_v40 }
  0x9e   : > { %1773 = vmatpush3.xpose.msra.mxu1 %v2338_v24 }
  0xa1   : > { %1775 = vmatmul.mubr.f32.vlgmr.msra.gmra.mxu1 %v2331_v20 }
  0xa4   : > { %1735 = vmatmul.mubr.bf16.gmra.mxu0 %v369_v42 }
  0xa5   : > { %1738 = vmatprep.mubr.bf16.mxu0 %v370_v38 }
  0xac   : > { %1739 = vmatmul.mubr.bf16.gmra.mxu0 %v371_v39 }
  0xee   : > { %v710_v59 = vpop.xlane.xlu1 %709  ;;  %v706_v60 = vpop.xlane.xlu0 %705 }
  0xef   : > { %740 = vst.msk [vmem:[#allocation5 + $0x10] sm:$0xff] %vm737_vm1, %v710_v59  ;;  %738 = vst.msk [vmem:[#allocation5] sm:$0xff] %vm737_vm1, %v706_v60 }
  0xf2   : > { %v712_v61 = vpop.xlane.xlu1 %711  ;;  %v708_v62 = vpop.xlane.xlu0 %707 }
  0xf3   : > { %741 = vst.msk [vmem:[#allocation5 + $0x18] sm:$0xff] %vm737_vm1, %v712_v61  ;;  %739 = vst.msk [vmem:[#allocation5 + $0x8] sm:$0xff] %vm737_vm1, %v708_v62 }
  0xf6   : > { %v716_v0 = vpop.xlane.xlu1 %715  ;;  %v756_v1 = vld [vmem:[#allocation5] sm:$0xff]  ;;  %v714_v2 = vpop.xlane.xlu0 %713  ;;  %v758_v7 = vld [vmem:[#allocation5 + $0x10] sm:$0xff] }
  0xf7   : > { %743 = vst.msk [vmem:[#allocation5 + $0x28] sm:$0xff] %vm737_vm1, %v716_v0  ;;  %775 = vperm.xlu0 %1901, %v756_v1   ;;  %742 = vst.msk [vmem:[#allocation5 + $0x20] sm:$0xff] %vm737_vm1, %v714_v2 }
  0xfa   : > { %v720_v4 = vpop.xlane.xlu1 %719  ;;  %v757_v5 = vld [vmem:[#allocation5 + $0x8] sm:$0xff]  ;;  %v718_v6 = vpop.xlane.xlu0 %717  ;;  %v759_v11 = vld [vmem:[#allocation5 + $0x18] sm:$0xff] }
  0xfb   : > { %745 = vst.msk [vmem:[#allocation5 + $0x38] sm:$0xff] %vm737_vm1, %v720_v4  ;;  %780 = vperm.xlu1 %1902, %v757_v5   ;;  %744 = vst.msk [vmem:[#allocation5 + $0x30] sm:$0xff] %vm737_vm1, %v718_v6  ;;  %v928_v6 = vld [vmem:[#allocation9 + $0x20] sm:$0xff] }
  0xfe   : > { %v724_v9 = vpop.xlane.xlu1 %723  ;;  %v722_v10 = vpop.xlane.xlu0 %721  ;;  %v760_v15 = vld [vmem:[#allocation5 + $0x20] sm:$0xff]  ;;  %v761_v27 = vld [vmem:[#allocation5 + $0x28] sm:$0xff] }
  0xff   : > { %747 = vst.msk [vmem:[#allocation5 + $0x48] sm:$0xff] %vm737_vm1, %v724_v9  ;;  %785 = vperm.xlu1 %1902, %v758_v7   ;;  %746 = vst.msk [vmem:[#allocation5 + $0x40] sm:$0xff] %vm737_vm1, %v722_v10 }
 0x102   : > { %v728_v13 = vpop.xlane.xlu1 %727  ;;  %v726_v14 = vpop.xlane.xlu0 %725  ;;  %v762_v24 = vld [vmem:[#allocation5 + $0x30] sm:$0xff]  ;;  %v763_v32 = vld [vmem:[#allocation5 + $0x38] sm:$0xff] }
 0x103   : > { %749 = vst.msk [vmem:[#allocation5 + $0x58] sm:$0xff] %vm737_vm1, %v728_v13  ;;  %790 = vperm.xlu1 %1902, %v759_v11   ;;  %748 = vst.msk [vmem:[#allocation5 + $0x50] sm:$0xff] %vm737_vm1, %v726_v14 }
 0x106   : > { %v732_v17 = vpop.xlane.xlu1 %731  ;;  %v765_v19 = vld [vmem:[#allocation5 + $0x48] sm:$0xff]  ;;  %v730_v20 = vpop.xlane.xlu0 %729  ;;  %v764_v37 = vld [vmem:[#allocation5 + $0x40] sm:$0xff] }
 0x107   : > { %751 = vst.msk [vmem:[#allocation5 + $0x68] sm:$0xff] %vm737_vm1, %v732_v17  ;;  %820 = vperm.xlu0 %1901, %v765_v19   ;;  %795 = vperm.xlu1 %1902, %v760_v15   ;;  %750 = vst.msk [vmem:[#allocation5 + $0x60] sm:$0xff] %vm737_vm1, %v730_v20 }
 0x10a   : > { %v736_v29 = vpop.xlane.xlu1 %735  ;;  %v767_v30 = vld [vmem:[#allocation5 + $0x58] sm:$0xff]  ;;  %v734_v31 = vpop.xlane.xlu0 %733  ;;  %v766_v33 = vld [vmem:[#allocation5 + $0x50] sm:$0xff] }
 0x10b   : > { %753 = vst.msk [vmem:[#allocation5 + $0x78] sm:$0xff] %vm737_vm1, %v736_v29  ;;  %830 = vperm.xlu0 %1901, %v767_v30   ;;  %800 = vperm.xlu1 %1902, %v761_v27   ;;  %752 = vst.msk [vmem:[#allocation5 + $0x70] sm:$0xff] %vm737_vm1, %v734_v31 }
 0x10e   : > { %v769_v25 = vld [vmem:[#allocation5 + $0x68] sm:$0xff]  ;;  %v768_v34 = vld [vmem:[#allocation5 + $0x60] sm:$0xff] }
 0x10f   : > { %840 = vperm.xlu0 %1901, %v769_v25   ;;  %805 = vperm.xlu1 %1902, %v762_v24  }
 0x112   : > { %v771_v36 = vld [vmem:[#allocation5 + $0x78] sm:$0xff]  ;;  %v770_v46 = vld [vmem:[#allocation5 + $0x70] sm:$0xff] }
 0x113   : > { %850 = vperm.xlu0 %1901, %v771_v36   ;;  %810 = vperm.xlu1 %1902, %v763_v32   ;;  %v931_v32 = vld [vmem:[#allocation9 + $0x38] sm:$0xff] }
 0x117   : > { %815 = vperm.xlu1 %1902, %v764_v37  }
 0x11b   : > { %825 = vperm.xlu1 %1902, %v766_v33  }
 0x11f   : > { %835 = vperm.xlu1 %1902, %v768_v34  }
 0x123   : > { %845 = vperm.xlu1 %1902, %v770_v46   ;;  %v932_v46 = vld [vmem:[#allocation9 + $0x40] sm:$0xff] }
 0x161   : > { %v680_v43 = vpop.f32.mrf.mxu1 }
 0x162   : > { %684 = vst [vmem:[#allocation4] sm:$0x1] %v680_v43  ;;  %v933_v43 = vld [vmem:[#allocation9 + $0x48] sm:$0xff] }
 0x163   : > { %v1776_v41 = vpop.f32.mrf.mxu1 }
 0x169   : > { %v2451_v44 = vld [vmem:[#allocation4] ss:$0 sm:$0xff] }
 0x172   : > { %v776_v45 = vpop.permute.xlu0 %775 }
 0x173   : > { %v859_v47 = vadd.f32 %v2451_v44, %v776_v45 }
 0x175   : > { %v891_v48 = vmul.f32 0.2, %v859_v47  ;;  %vm875_vm2 = vcmp.gt.f32.partialorder %v859_v47, 0.0 }
 0x176   : > { %v781_v28 = vpop.permute.xlu1 %780 }
 0x177   : > { %v860_v35 = vadd.f32 %v2451_v44, %v781_v28  ;;  %v907_v18 = vsel %vm875_vm2, %v859_v47, %v891_v48 }
 0x178   : > { %v2455_v21 = vadd.f32 %v924_v49, %v907_v18  ;;  %v935_v18 = vld [vmem:[#allocation9 + $0x58] sm:$0xff] }
 0x179   : > { %v892_v50 = vmul.f32 0.2, %v860_v35  ;;  %vm876_vm3 = vcmp.gt.f32.partialorder %v860_v35, 0.0 }
 0x17a   : > { %v786_v52 = vpop.permute.xlu1 %785  ;;  %956 = vmax.xlane.f32.xlu1 %v2455_v21 }
 0x17b   : > { %v861_v53 = vadd.f32 %v2451_v44, %v786_v52  ;;  %v908_v54 = vsel %vm876_vm3, %v860_v35, %v892_v50 }
 0x17c   : > { %v2459_v55 = vadd.f32 %v925_v51, %v908_v54 }
 0x17d   : > { %v893_v56 = vmul.f32 0.2, %v861_v53  ;;  %vm877_vm4 = vcmp.gt.f32.partialorder %v861_v53, 0.0 }
 0x17e   : > { %v791_v58 = vpop.permute.xlu1 %790  ;;  %958 = vmax.xlane.f32.xlu0 %v2459_v55 }
 0x17f   : > { %v862_v59 = vadd.f32 %v2451_v44, %v791_v58  ;;  %v909_v60 = vsel %vm877_vm4, %v861_v53, %v893_v56  ;;  %v934_v53 = vld [vmem:[#allocation9 + $0x50] sm:$0xff] }
 0x180   : > { %v2463_v61 = vadd.f32 %v926_v57, %v909_v60  ;;  %v937_v60 = vld [vmem:[#allocation9 + $0x68] sm:$0xff] }
 0x181   : > { %v894_v62 = vmul.f32 0.2, %v862_v59  ;;  %vm878_vm5 = vcmp.gt.f32.partialorder %v862_v59, 0.0 }
 0x182   : > { %v796_v0 = vpop.permute.xlu1 %795  ;;  %960 = vmax.xlane.f32.xlu0 %v2463_v61  ;;  %v821_v3 = vpop.permute.xlu0 %820 }
 0x183   : > { %v863_v1 = vadd.f32 %v2451_v44, %v796_v0  ;;  %v910_v2 = vsel %vm878_vm5, %v862_v59, %v894_v62  ;;  %v868_v17 = vadd.f32 %v2451_v44, %v821_v3  ;;  %v936_v0 = vld [vmem:[#allocation9 + $0x60] sm:$0xff] }
 0x184   : > { %v2467_v4 = vadd.f32 %v927_v63, %v910_v2 }
 0x185   : > { %v895_v5 = vmul.f32 0.2, %v863_v1  ;;  %vm879_vm6 = vcmp.gt.f32.partialorder %v863_v1, 0.0  ;;  %v900_v31 = vmul.f32 0.2, %v868_v17  ;;  %vm884_vm10 = vcmp.gt.f32.partialorder %v868_v17, 0.0 }
 0x186   : > { %v801_v7 = vpop.permute.xlu1 %800  ;;  %962 = vmax.xlane.f32.xlu1 %v2467_v4  ;;  %v831_v13 = vpop.permute.xlu0 %830 }
 0x187   : > { %v864_v8 = vadd.f32 %v2451_v44, %v801_v7  ;;  %v911_v9 = vsel %vm879_vm6, %v863_v1, %v895_v5  ;;  %v870_v24 = vadd.f32 %v2451_v44, %v831_v13  ;;  %v916_v34 = vsel %vm884_vm10, %v868_v17, %v900_v31 }
 0x188   : > { %v2471_v10 = vadd.f32 %v928_v6, %v911_v9  ;;  %v2492_v28 = vadd.f32 %v933_v43, %v916_v34  ;;  %v938_v9 = vld [vmem:[#allocation9 + $0x70] sm:$0xff] }
 0x189   : > { %v896_v11 = vmul.f32 0.2, %v864_v8  ;;  %vm880_vm7 = vcmp.gt.f32.partialorder %v864_v8, 0.0  ;;  %v902_v42 = vmul.f32 0.2, %v870_v24  ;;  %vm886_vm12 = vcmp.gt.f32.partialorder %v870_v24, 0.0 }
 0x18a   : > { %v806_v14 = vpop.permute.xlu1 %805  ;;  %964 = vmax.xlane.f32.xlu0 %v2471_v10  ;;  %v841_v22 = vpop.permute.xlu0 %840 }
 0x18b   : > { %v865_v15 = vadd.f32 %v2451_v44, %v806_v14  ;;  %v912_v16 = vsel %vm880_vm7, %v864_v8, %v896_v11  ;;  %v872_v38 = vadd.f32 %v2451_v44, %v841_v22  ;;  %v918_v35 = vsel %vm886_vm12, %v870_v24, %v902_v42 }
 0x18c   : > { %v2476_v19 = vadd.f32 %v929_v12, %v912_v16  ;;  %v2500_v59 = vadd.f32 %v935_v18, %v918_v35  ;;  %v939_v12 = vld [vmem:[#allocation9 + $0x78] sm:$0xff] }
 0x18d   : > { %v897_v20 = vmul.f32 0.2, %v865_v15  ;;  %vm881_vm8 = vcmp.gt.f32.partialorder %v865_v15, 0.0  ;;  %v904_v50 = vmul.f32 0.2, %v872_v38  ;;  %vm888_vm14 = vcmp.gt.f32.partialorder %v872_v38, 0.0 }
 0x18e   : > { %v811_v27 = vpop.permute.xlu1 %810  ;;  %966 = vmax.xlane.f32.xlu1 %v2476_v19  ;;  %v851_v41 = vpop.permute.xlu0 %850 }
 0x18f   : > { %v866_v29 = vadd.f32 %v2451_v44, %v811_v27  ;;  %v913_v30 = vsel %vm881_vm8, %v865_v15, %v897_v20  ;;  %v874_v51 = vadd.f32 %v2451_v44, %v851_v41  ;;  %v920_v1 = vsel %vm888_vm14, %v872_v38, %v904_v50 }
 0x190   : > { %v2481_v25 = vadd.f32 %v930_v23, %v913_v30  ;;  %v2507_v7 = vadd.f32 %v937_v60, %v920_v1 }
 0x191   : > { %v898_v26 = vmul.f32 0.2, %v866_v29  ;;  %vm882_vm9 = vcmp.gt.f32.partialorder %v866_v29, 0.0  ;;  %v906_v62 = vmul.f32 0.2, %v874_v51  ;;  %vm890_vm0 = vcmp.gt.f32.partialorder %v874_v51, 0.0 }
 0x192   : > { %v816_v36 = vpop.permute.xlu1 %815  ;;  %968 = vmax.xlane.f32.xlu0 %v2481_v25 }
 0x193   : > { %v867_v37 = vadd.f32 %v2451_v44, %v816_v36  ;;  %v914_v40 = vsel %vm882_vm9, %v866_v29, %v898_v26  ;;  %v922_v11 = vsel %vm890_vm0, %v874_v51, %v906_v62 }
 0x194   : > { %v2485_v33 = vadd.f32 %v931_v32, %v914_v40  ;;  %v2513_v15 = vadd.f32 %v939_v12, %v922_v11 }
 0x195   : > { %v899_v39 = vmul.f32 0.2, %v867_v37  ;;  %vm883_vm11 = vcmp.gt.f32.partialorder %v867_v37, 0.0 }
 0x196   : > { %v826_v45 = vpop.permute.xlu1 %825  ;;  %970 = vmax.xlane.f32.xlu1 %v2485_v33 }
 0x197   : > { %v869_v47 = vadd.f32 %v2451_v44, %v826_v45  ;;  %v915_v48 = vsel %vm883_vm11, %v867_v37, %v899_v39 }
 0x198   : > { %v2490_v49 = vadd.f32 %v932_v46, %v915_v48 }
 0x199   : > { %v901_v52 = vmul.f32 0.2, %v869_v47  ;;  %vm885_vm13 = vcmp.gt.f32.partialorder %v869_v47, 0.0 }
 0x19a   : > { %v836_v54 = vpop.permute.xlu1 %835  ;;  %972 = vmax.xlane.f32.xlu0 %v2490_v49  ;;  %974 = vmax.xlane.f32.xlu1 %v2492_v28 }
 0x19b   : > { %v871_v56 = vadd.f32 %v2451_v44, %v836_v54  ;;  %v917_v57 = vsel %vm885_vm13, %v869_v47, %v901_v52 }
 0x19c   : > { %v2498_v58 = vadd.f32 %v934_v53, %v917_v57 }
 0x19d   : > { %v903_v63 = vmul.f32 0.2, %v871_v56  ;;  %vm887_vm15 = vcmp.gt.f32.partialorder %v871_v56, 0.0 }
 0x19e   : > { %v846_v2 = vpop.permute.xlu1 %845  ;;  %976 = vmax.xlane.f32.xlu0 %v2498_v58  ;;  %978 = vmax.xlane.f32.xlu1 %v2500_v59 }
 0x19f   : > { %v873_v3 = vadd.f32 %v2451_v44, %v846_v2  ;;  %v919_v5 = vsel %vm887_vm15, %v871_v56, %v903_v63  ;;  %v1728_v44 = vpop.f32.mrf.mxu0 }
 0x1a0   : > { %v2505_v6 = vadd.f32 %v936_v0, %v919_v5 }
 0x1a1   : > { %v905_v8 = vmul.f32 0.2, %v873_v3  ;;  %vm889_vm1 = vcmp.gt.f32.partialorder %v873_v3, 0.0  ;;  %v470_v16 = vpop.f32.mrf.mxu0 }
 0x1a2   : > { %980 = vmax.xlane.f32.xlu0 %v2505_v6  ;;  %982 = vmax.xlane.f32.xlu1 %v2507_v7 }
 0x1a3   : > { %v921_v13 = vsel %vm889_vm1, %v873_v3, %v905_v8  ;;  %v1729_v17 = vpop.f32.mrf.mxu0 }
 0x1a4   : > { %v2511_v14 = vadd.f32 %v938_v9, %v921_v13  ;;  %v1622_v20 = vpack.c.bf16 %v1729_v17, %v1728_v44 }
 0x1a5   : > { %v473_v23 = vpop.f32.mrf.mxu0 }
 0x1a6   : > { %984 = vmax.xlane.f32.xlu0 %v2511_v14  ;;  %986 = vmax.xlane.f32.xlu1 %v2513_v15  ;;  %1654 = vst [vmem:[#allocation3 + $0x8] sm:$0xff] %v1622_v20   ;;  %v1617_v27 = vpack.c.bf16 %v473_v23, %v470_v16 }
 0x1a7   : > { %v1732_v29 = vpop.f32.mrf.mxu0 }
 0x1a8   : > { %1618 = vst [vmem:[#allocation3] sm:$0xff] %v1617_v27  }
 0x1a9   : > { %v486_v30 = vpop.f32.mrf.mxu0 }
 0x1ab   : > { %v1733_v31 = vpop.f32.mrf.mxu0 }
 0x1ac   : > { %v1632_v24 = vpack.c.bf16 %v1733_v31, %v1732_v29 }
 0x1ad   : > { %v489_v22 = vpop.f32.mrf.mxu0  ;;  %v1917_v53 = vld [vmem:[#allocation3 + $0x8] sm:$0xff]  }
 0x1ae   : > { %1656 = vst [vmem:[#allocation3 + $0x18] sm:$0xff] %v1632_v24   ;;  %v1627_v26 = vpack.c.bf16 %v489_v22, %v486_v30 }
 0x1af   : > { %v1736_v32 = vpop.f32.mrf.mxu0  ;;  %v1918_v60 = vld [vmem:[#allocation3] sm:$0xff]  }
 0x1b0   : > { %1655 = vst [vmem:[#allocation3 + $0x10] sm:$0xff] %v1627_v26  }
 0x1b1   : > { %v502_v36 = vpop.f32.mrf.mxu0 }
 0x1b3   : > { %v1737_v37 = vpop.f32.mrf.mxu0 }
 0x1b4   : > { %v1642_v40 = vpack.c.bf16 %v1737_v37, %v1736_v32 }
 0x1b5   : > { %v505_v42 = vpop.f32.mrf.mxu0  ;;  %v1915_v50 = vld [vmem:[#allocation3 + $0x18] sm:$0xff]  }
 0x1b6   : > { %1658 = vst [vmem:[#allocation3 + $0x28] sm:$0xff] %v1642_v40   ;;  %v1637_v34 = vpack.c.bf16 %v505_v42, %v502_v36 }
 0x1b7   : > { %v1740_v38 = vpop.f32.mrf.mxu0  ;;  %v1916_v51 = vld [vmem:[#allocation3 + $0x10] sm:$0xff]  }
 0x1b8   : > { %1657 = vst [vmem:[#allocation3 + $0x20] sm:$0xff] %v1637_v34  }
 0x1b9   : > { %v518_v39 = vpop.f32.mrf.mxu0 }
 0x1bb   : > { %v1741_v46 = vpop.f32.mrf.mxu0 }
 0x1bc   : > { %v1652_v43 = vpack.c.bf16 %v1741_v46, %v1740_v38 }
 0x1bd   : > { %v521_v41 = vpop.f32.mrf.mxu0  ;;  %v1913_v35 = vld [vmem:[#allocation3 + $0x28] sm:$0xff]  }
 0x1be   : > { %1660 = vst [vmem:[#allocation3 + $0x38] sm:$0xff] %v1652_v43   ;;  %v1647_v45 = vpack.c.bf16 %v521_v41, %v518_v39 }
 0x1bf   : > { %v1914_v18 = vld [vmem:[#allocation3 + $0x20] sm:$0xff]  }
 0x1c0   : > { %1659 = vst [vmem:[#allocation3 + $0x30] sm:$0xff] %v1647_v45  }
 0x1c5   : > { %v1911_v47 = vld [vmem:[#allocation3 + $0x38] sm:$0xff]  }
 0x1c6   : > { %1777 = vmatprep.subr.bf16.mxu0 %v1911_v47 }
 0x1c7   : > { %v1912_v48 = vld [vmem:[#allocation3 + $0x30] sm:$0xff]   ;;  %1778 = vmatpush3.bf16.msra.mxu0 %v1911_v47 }
 0x1c8   : > { %1779 = vmatprep.subr.bf16.mxu0 %v1912_v48 }
 0x1cb   : > { %1780 = vmatpush3.bf16.msra.mxu0 %v1912_v48 }
 0x1cc   : > { %1781 = vmatprep.subr.bf16.mxu0 %v1913_v35 }
 0x1cf   : > { %1782 = vmatpush3.bf16.msra.mxu0 %v1913_v35 }
 0x1d0   : > { %1783 = vmatprep.subr.bf16.mxu0 %v1914_v18 }
 0x1d3   : > { %1784 = vmatpush3.bf16.msra.mxu0 %v1914_v18 }
 0x1d4   : > { %1785 = vmatprep.subr.bf16.mxu0 %v1915_v50 }
 0x1d7   : > { %1786 = vmatpush3.bf16.msra.mxu0 %v1915_v50 }
 0x1d8   : > { %1787 = vmatprep.subr.bf16.mxu0 %v1916_v51 }
 0x1db   : > { %1788 = vmatpush3.bf16.msra.mxu0 %v1916_v51 }
 0x1dc   : > { %1789 = vmatprep.subr.bf16.mxu0 %v1917_v53 }
 0x1df   : > { %1790 = vmatpush3.bf16.msra.mxu0 %v1917_v53 }
 0x1e0   : > { %1791 = vmatprep.subr.bf16.mxu0 %v1918_v60 }
 0x1e3   : > { %1792 = vmatpush3.bf16.msra.mxu0 %v1918_v60 }
 0x203   : > { %v957_v52 = vpop.xlane.xlu1 %956 }
 0x204   : > { %vm988_vm2 = vcmp.gt.f32.partialorder %v957_v52, -1e+29 }
 0x205   : > { %v1004_v54 = vsel %vm988_vm2, %v957_v52, 0.0 }
 0x206   : > { %v1020_v56 = vsub.f32 %v2455_v21, %v1004_v54 }
 0x207   : > { %v959_v57 = vpop.xlane.xlu0 %958 }
 0x208   : > { %v1036_v62 = vmul.f32 1.442695, %v1020_v56  ;;  %vm989_vm3 = vcmp.gt.f32.partialorder %v959_v57, -1e+29 }
 0x209   : > { %v1005_v63 = vsel %vm989_vm3, %v959_v57, 0.0 }
 0x20a   : > { %1919 = vpow2.f32 %v1036_v62  ;;  %v1021_v0 = vsub.f32 %v2459_v55, %v1005_v63 }
 0x20b   : > { %v961_v1 = vpop.xlane.xlu0 %960 }
 0x20c   : > { %v1038_v2 = vmul.f32 1.442695, %v1021_v0  ;;  %vm990_vm4 = vcmp.gt.f32.partialorder %v961_v1, -1e+29 }
 0x20d   : > { %v1006_v3 = vsel %vm990_vm4, %v961_v1, 0.0 }
 0x20e   : > { %1921 = vpow2.f32 %v1038_v2  ;;  %v1022_v5 = vsub.f32 %v2463_v61, %v1006_v3 }
 0x20f   : > { %v963_v21 = vpop.xlane.xlu1 %962 }
 0x210   : > { %v1040_v8 = vmul.f32 1.442695, %v1022_v5  ;;  %vm991_vm5 = vcmp.gt.f32.partialorder %v963_v21, -1e+29 }
 0x211   : > { %v1007_v9 = vsel %vm991_vm5, %v963_v21, 0.0 }
 0x212   : > { %1923 = vpow2.f32 %v1040_v8  ;;  %v1023_v11 = vsub.f32 %v2467_v4, %v1007_v9 }
 0x213   : > { %v965_v12 = vpop.xlane.xlu0 %964 }
 0x214   : > { %v1042_v13 = vmul.f32 1.442695, %v1023_v11  ;;  %vm992_vm6 = vcmp.gt.f32.partialorder %v965_v12, -1e+29 }
 0x215   : > { %v1008_v55 = vsel %vm992_vm6, %v965_v12, 0.0 }
 0x216   : > { %1925 = vpow2.f32 %v1042_v13  ;;  %v1024_v44 = vsub.f32 %v2471_v10, %v1008_v55 }
 0x217   : > { %v2522_v16 = vpop.eup %1919  ;;  %v967_v17 = vpop.xlane.xlu1 %966 }
 0x218   : > { %v1044_v20 = vmul.f32 1.442695, %v1024_v44  ;;  %vm993_vm7 = vcmp.gt.f32.partialorder %v967_v17, -1e+29  ;;  %1068 = vadd.xlane.f32.xlu0 %v2522_v16 }
 0x219   : > { %v1009_v61 = vsel %vm993_vm7, %v967_v17, 0.0 }
 0x21a   : > { %1927 = vpow2.f32 %v1044_v20  ;;  %v1025_v23 = vsub.f32 %v2476_v19, %v1009_v61 }
 0x21b   : > { %v2526_v27 = vpop.eup %1921  ;;  %v969_v4 = vpop.xlane.xlu0 %968 }
 0x21c   : > { %v1046_v29 = vmul.f32 1.442695, %v1025_v23  ;;  %vm994_vm8 = vcmp.gt.f32.partialorder %v969_v4, -1e+29  ;;  %1070 = vadd.xlane.f32.xlu1 %v2526_v27 }
 0x21d   : > { %v1010_v30 = vsel %vm994_vm8, %v969_v4, 0.0 }
 0x21e   : > { %1929 = vpow2.f32 %v1046_v29  ;;  %v1026_v10 = vsub.f32 %v2481_v25, %v1010_v30 }
 0x21f   : > { %v2530_v31 = vpop.eup %1923  ;;  %v971_v24 = vpop.xlane.xlu1 %970 }
 0x220   : > { %v1048_v22 = vmul.f32 1.442695, %v1026_v10  ;;  %vm995_vm9 = vcmp.gt.f32.partialorder %v971_v24, -1e+29  ;;  %1072 = vadd.xlane.f32.xlu0 %v2530_v31 }
 0x221   : > { %v1011_v26 = vsel %vm995_vm9, %v971_v24, 0.0 }
 0x222   : > { %1931 = vpow2.f32 %v1048_v22  ;;  %v1027_v19 = vsub.f32 %v2485_v33, %v1011_v26 }
 0x223   : > { %v2534_v32 = vpop.eup %1925  ;;  %v973_v36 = vpop.xlane.xlu0 %972 }
 0x224   : > { %v975_v37 = vpop.xlane.xlu1 %974  ;;  %v1050_v40 = vmul.f32 1.442695, %v1027_v19  ;;  %vm996_vm10 = vcmp.gt.f32.partialorder %v973_v36, -1e+29  ;;  %1074 = vadd.xlane.f32.xlu1 %v2534_v32 }
 0x225   : > { %vm997_vm11 = vcmp.gt.f32.partialorder %v975_v37, -1e+29  ;;  %v1012_v25 = vsel %vm996_vm10, %v973_v36, 0.0 }
 0x226   : > { %v1013_v42 = vsel %vm997_vm11, %v975_v37, 0.0  ;;  %1933 = vpow2.f32 %v1050_v40  ;;  %v1028_v34 = vsub.f32 %v2490_v49, %v1012_v25 }
 0x227   : > { %v1029_v38 = vsub.f32 %v2492_v28, %v1013_v42  ;;  %v2539_v39 = vpop.eup %1927  ;;  %v977_v46 = vpop.xlane.xlu0 %976 }
 0x228   : > { %v979_v33 = vpop.xlane.xlu1 %978  ;;  %v1052_v43 = vmul.f32 1.442695, %v1028_v34  ;;  %vm998_vm12 = vcmp.gt.f32.partialorder %v977_v46, -1e+29  ;;  %1076 = vadd.xlane.f32.xlu0 %v2539_v39 }
 0x229   : > { %v1054_v41 = vmul.f32 1.442695, %v1029_v38  ;;  %v1014_v45 = vsel %vm998_vm12, %v977_v46, 0.0  ;;  %vm999_vm13 = vcmp.gt.f32.partialorder %v979_v33, -1e+29 }
 0x22a   : > { %1935 = vpow2.f32 %v1052_v43  ;;  %v1030_v47 = vsub.f32 %v2498_v58, %v1014_v45  ;;  %v1015_v48 = vsel %vm999_vm13, %v979_v33, 0.0 }
 0x22b   : > { %v2543_v35 = vpop.eup %1929  ;;  %1937 = vpow2.f32 %v1054_v41  ;;  %v1031_v49 = vsub.f32 %v2500_v59, %v1015_v48  ;;  %v981_v28 = vpop.xlane.xlu0 %980 }
 0x22c   : > { %v983_v18 = vpop.xlane.xlu1 %982  ;;  %v1056_v50 = vmul.f32 1.442695, %v1030_v47  ;;  %vm1000_vm14 = vcmp.gt.f32.partialorder %v981_v28, -1e+29  ;;  %1078 = vadd.xlane.f32.xlu1 %v2543_v35 }
 0x22d   : > { %vm1001_vm15 = vcmp.gt.f32.partialorder %v983_v18, -1e+29  ;;  %v1058_v51 = vmul.f32 1.442695, %v1031_v49  ;;  %v1016_v52 = vsel %vm1000_vm14, %v981_v28, 0.0 }
 0x22e   : > { %v1017_v53 = vsel %vm1001_vm15, %v983_v18, 0.0  ;;  %1939 = vpow2.f32 %v1056_v50  ;;  %v1032_v54 = vsub.f32 %v2505_v6, %v1016_v52 }
 0x22f   : > { %v1033_v58 = vsub.f32 %v2507_v7, %v1017_v53  ;;  %v2549_v56 = vpop.eup %1931  ;;  %1941 = vpow2.f32 %v1058_v51  ;;  %v985_v57 = vpop.xlane.xlu0 %984 }
 0x230   : > { %v987_v59 = vpop.xlane.xlu1 %986  ;;  %v1060_v60 = vmul.f32 1.442695, %v1032_v54  ;;  %vm1002_vm0 = vcmp.gt.f32.partialorder %v985_v57, -1e+29  ;;  %1080 = vadd.xlane.f32.xlu0 %v2549_v56 }
 0x231   : > { %v1062_v62 = vmul.f32 1.442695, %v1033_v58  ;;  %v1018_v63 = vsel %vm1002_vm0, %v985_v57, 0.0  ;;  %vm1003_vm1 = vcmp.gt.f32.partialorder %v987_v59, -1e+29 }
 0x232   : > { %1943 = vpow2.f32 %v1060_v60  ;;  %v1034_v0 = vsub.f32 %v2511_v14, %v1018_v63  ;;  %v1019_v1 = vsel %vm1003_vm1, %v987_v59, 0.0 }
 0x233   : > { %v2553_v2 = vpop.eup %1933  ;;  %1945 = vpow2.f32 %v1062_v62  ;;  %v1035_v6 = vsub.f32 %v2513_v15, %v1019_v1 }
 0x234   : > { %v1064_v7 = vmul.f32 1.442695, %v1034_v0  ;;  %1082 = vadd.xlane.f32.xlu1 %v2553_v2 }
 0x235   : > { %v1066_v3 = vmul.f32 1.442695, %v1035_v6 }
 0x236   : > { %1947 = vpow2.f32 %v1064_v7 }
 0x237   : > { %v2557_v5 = vpop.eup %1935  ;;  %1949 = vpow2.f32 %v1066_v3 }
 0x238   : > { %v2559_v21 = vpop.eup %1937  ;;  %1084 = vadd.xlane.f32.xlu0 %v2557_v5 }
 0x239   : > { %1086 = vadd.xlane.f32.xlu1 %v2559_v21 }
 0x23b   : > { %v2563_v14 = vpop.eup %1939 }
 0x23c   : > { %v2565_v8 = vpop.eup %1941  ;;  %1088 = vadd.xlane.f32.xlu0 %v2563_v14 }
 0x23d   : > { %1090 = vadd.xlane.f32.xlu1 %v2565_v8 }
 0x23f   : > { %v2569_v15 = vpop.eup %1943 }
 0x240   : > { %v2571_v9 = vpop.eup %1945  ;;  %1092 = vadd.xlane.f32.xlu0 %v2569_v15 }
 0x241   : > { %1094 = vadd.xlane.f32.xlu1 %v2571_v9 }
 0x243   : > { %v2575_v11 = vpop.eup %1947 }
 0x244   : > { %v2577_v12 = vpop.eup %1949  ;;  %1096 = vadd.xlane.f32.xlu0 %v2575_v11 }
 0x245   : > { %1098 = vadd.xlane.f32.xlu1 %v2577_v12 }
 0x2a1   : > { %v1069_v13 = vpop.xlane.xlu0 %1068 }
 0x2a2   : > { %1951 = vrcp.f32 %v1069_v13  ;;  %vm1100_vm2 = vcmp.gt.f32.partialorder %v1069_v13, 0.0 }
 0x2a5   : > { %v1071_v55 = vpop.xlane.xlu1 %1070 }
 0x2a6   : > { %1953 = vrcp.f32 %v1071_v55  ;;  %vm1101_vm3 = vcmp.gt.f32.partialorder %v1071_v55, 0.0 }
 0x2a9   : > { %v1073_v44 = vpop.xlane.xlu0 %1072 }
 0x2aa   : > { %1955 = vrcp.f32 %v1073_v44  ;;  %vm1102_vm4 = vcmp.gt.f32.partialorder %v1073_v44, 0.0 }
 0x2ad   : > { %v1075_v17 = vpop.xlane.xlu1 %1074 }
 0x2ae   : > { %1957 = vrcp.f32 %v1075_v17  ;;  %vm1103_vm5 = vcmp.gt.f32.partialorder %v1075_v17, 0.0 }
 0x2af   : > { %v1952_v20 = vpop.eup %1951 }
 0x2b0   : > { %v1132_v23 = vsel %vm1100_vm2, %v1952_v20, 0.0 }
 0x2b1   : > { %v1077_v61 = vpop.xlane.xlu0 %1076  ;;  %v1148_v30 = vmul.f32 %v2522_v16, %v1132_v23 }
 0x2b2   : > { %1959 = vrcp.f32 %v1077_v61  ;;  %vm1104_vm6 = vcmp.gt.f32.partialorder %v1077_v61, 0.0 }
 0x2b3   : > { %v1954_v4 = vpop.eup %1953 }
 0x2b4   : > { %v1133_v29 = vsel %vm1101_vm3, %v1954_v4, 0.0 }
 0x2b5   : > { %v1149_v10 = vmul.f32 %v2526_v27, %v1133_v29  ;;  %v1079_v24 = vpop.xlane.xlu1 %1078 }
 0x2b6   : > { %1961 = vrcp.f32 %v1079_v24  ;;  %vm1105_vm7 = vcmp.gt.f32.partialorder %v1079_v24, 0.0 }
 0x2b7   : > { %v1956_v22 = vpop.eup %1955  ;;  %v1164_v26 = vpack.c.bf16 %v1149_v10, %v1148_v30 }
 0x2b8   : > { %v1134_v36 = vsel %vm1102_vm4, %v1956_v22, 0.0 }
 0x2b9   : > { %v1081_v19 = vpop.xlane.xlu0 %1080  ;;  %1793 = vmatprep.mubr.bf16.mxu0 %v1164_v26  ;;  %v1150_v25 = vmul.f32 %v2530_v31, %v1134_v36 }
 0x2ba   : > { %1963 = vrcp.f32 %v1081_v19  ;;  %vm1106_vm8 = vcmp.gt.f32.partialorder %v1081_v19, 0.0 }
 0x2bb   : > { %v1958_v37 = vpop.eup %1957 }
 0x2bc   : > { %v1135_v40 = vsel %vm1103_vm5, %v1958_v37, 0.0 }
 0x2bd   : > { %v1151_v42 = vmul.f32 %v2534_v32, %v1135_v40  ;;  %v1083_v34 = vpop.xlane.xlu1 %1082 }
 0x2be   : > { %1965 = vrcp.f32 %v1083_v34  ;;  %vm1107_vm9 = vcmp.gt.f32.partialorder %v1083_v34, 0.0 }
 0x2bf   : > { %v1960_v16 = vpop.eup %1959  ;;  %v1165_v27 = vpack.c.bf16 %v1151_v42, %v1150_v25 }
 0x2c0   : > { %v1136_v46 = vsel %vm1104_vm6, %v1960_v16, 0.0 }
 0x2c1   : > { %v1085_v38 = vpop.xlane.xlu0 %1084  ;;  %1794 = vmatmul.mubr.bf16.vlgmr.msra.gmra.mxu0 %v1165_v27  ;;  %v1152_v45 = vmul.f32 %v2539_v39, %v1136_v46 }
 0x2c2   : > { %1967 = vrcp.f32 %v1085_v38  ;;  %v1087_v33 = vpop.xlane.xlu1 %1086  ;;  %vm1108_vm10 = vcmp.gt.f32.partialorder %v1085_v38, 0.0 }
 0x2c3   : > { %v1962_v43 = vpop.eup %1961  ;;  %1969 = vrcp.f32 %v1087_v33  ;;  %vm1109_vm11 = vcmp.gt.f32.partialorder %v1087_v33, 0.0 }
 0x2c4   : > { %v1137_v41 = vsel %vm1105_vm7, %v1962_v43, 0.0 }
 0x2c5   : > { %v1153_v31 = vmul.f32 %v2543_v35, %v1137_v41  ;;  %v1089_v47 = vpop.xlane.xlu0 %1088 }
 0x2c6   : > { %1971 = vrcp.f32 %v1089_v47  ;;  %v1091_v32 = vpop.xlane.xlu1 %1090  ;;  %vm1110_vm12 = vcmp.gt.f32.partialorder %v1089_v47, 0.0 }
 0x2c7   : > { %v1964_v48 = vpop.eup %1963  ;;  %1973 = vrcp.f32 %v1091_v32  ;;  %v1166_v49 = vpack.c.bf16 %v1153_v31, %v1152_v45  ;;  %vm1111_vm13 = vcmp.gt.f32.partialorder %v1091_v32, 0.0 }
 0x2c8   : > { %v1138_v18 = vsel %vm1106_vm8, %v1964_v48, 0.0 }
 0x2c9   : > { %v1093_v28 = vpop.xlane.xlu0 %1092  ;;  %1797 = vmatprep.mubr.bf16.mxu0 %v1166_v49  ;;  %v1154_v39 = vmul.f32 %v2549_v56, %v1138_v18 }
 0x2ca   : > { %1975 = vrcp.f32 %v1093_v28  ;;  %v1095_v50 = vpop.xlane.xlu1 %1094  ;;  %vm1112_vm14 = vcmp.gt.f32.partialorder %v1093_v28, 0.0 }
 0x2cb   : > { %v1966_v51 = vpop.eup %1965  ;;  %1977 = vrcp.f32 %v1095_v50  ;;  %vm1113_vm15 = vcmp.gt.f32.partialorder %v1095_v50, 0.0 }
 0x2cc   : > { %v1139_v52 = vsel %vm1107_vm9, %v1966_v51, 0.0 }
 0x2cd   : > { %v1155_v35 = vmul.f32 %v2553_v2, %v1139_v52  ;;  %v1097_v53 = vpop.xlane.xlu0 %1096 }
 0x2ce   : > { %1979 = vrcp.f32 %v1097_v53  ;;  %v1099_v54 = vpop.xlane.xlu1 %1098  ;;  %vm1114_vm0 = vcmp.gt.f32.partialorder %v1097_v53, 0.0 }
 0x2cf   : > { %v1968_v58 = vpop.eup %1967  ;;  %1981 = vrcp.f32 %v1099_v54  ;;  %v1167_v57 = vpack.c.bf16 %v1155_v35, %v1154_v39  ;;  %vm1115_vm1 = vcmp.gt.f32.partialorder %v1099_v54, 0.0 }
 0x2d0   : > { %v1970_v59 = vpop.eup %1969  ;;  %v1140_v60 = vsel %vm1108_vm10, %v1968_v58, 0.0 }
 0x2d1   : > { %v1156_v62 = vmul.f32 %v2557_v5, %v1140_v60  ;;  %v1141_v63 = vsel %vm1109_vm11, %v1970_v59, 0.0  ;;  %1798 = vmatmul.mubr.bf16.gmra.mxu0 %v1167_v57 }
 0x2d2   : > { %v1157_v0 = vmul.f32 %v2559_v21, %v1141_v63 }
 0x2d3   : > { %v1972_v1 = vpop.eup %1971 }
 0x2d4   : > { %v1974_v56 = vpop.eup %1973  ;;  %v1142_v2 = vsel %vm1110_vm12, %v1972_v1, 0.0  ;;  %v1168_v6 = vpack.c.bf16 %v1157_v0, %v1156_v62 }
 0x2d5   : > { %v1158_v7 = vmul.f32 %v2563_v14, %v1142_v2  ;;  %v1143_v3 = vsel %vm1111_vm13, %v1974_v56, 0.0 }
 0x2d6   : > { %v1159_v13 = vmul.f32 %v2565_v8, %v1143_v3  ;;  %1801 = vmatprep.mubr.bf16.mxu0 %v1168_v6 }
 0x2d7   : > { %v1976_v55 = vpop.eup %1975 }
 0x2d8   : > { %v1978_v44 = vpop.eup %1977  ;;  %v1144_v5 = vsel %vm1112_vm14, %v1976_v55, 0.0  ;;  %v1169_v17 = vpack.c.bf16 %v1159_v13, %v1158_v7 }
 0x2d9   : > { %v1160_v21 = vmul.f32 %v2569_v15, %v1144_v5  ;;  %v1145_v20 = vsel %vm1113_vm15, %v1978_v44, 0.0  ;;  %v2602_v15 = vld [vmem:[%s305_s8] ss:$0 sm:$0xff] }
 0x2da   : > { %v1161_v61 = vmul.f32 %v2571_v9, %v1145_v20  ;;  %1802 = vmatmul.mubr.bf16.gmra.mxu0 %v1169_v17 }
 0x2db   : > { %v1980_v23 = vpop.eup %1979 }
 0x2dc   : > { %v1982_v14 = vpop.eup %1981  ;;  %v1146_v4 = vsel %vm1114_vm0, %v1980_v23, 0.0  ;;  %v1170_v8 = vpack.c.bf16 %v1161_v61, %v1160_v21 }
 0x2dd   : > { %v1162_v29 = vmul.f32 %v2575_v11, %v1146_v4  ;;  %v1147_v30 = vsel %vm1115_vm1, %v1982_v14, 0.0 }
 0x2de   : > { %v1163_v10 = vmul.f32 %v2577_v12, %v1147_v30  ;;  %1805 = vmatprep.mubr.bf16.mxu0 %v1170_v8 }
 0x2e0   : > { %v1171_v24 = vpack.c.bf16 %v1163_v10, %v1162_v29 }
 0x2e2   : > { %1806 = vmatmul.mubr.bf16.gmra.mxu0 %v1171_v24 }
 0x381   : > { %v1795_v9 = vpop.f32.mrf.mxu0 }
 0x382   : > { %v1286_v22 = vadd.f32 %v1795_v9, %v2602_v15 }
 0x383   : > { %v1277_v26 = vpop.f32.mrf.mxu0 }
 0x384   : > { %vm1342_vm2 = vcmp.gt.f32.partialorder %v1286_v22, 0.0  ;;  %v1358_v19 = vmul.f32 0.2, %v1286_v22  ;;  %v1278_v11 = vadd.f32 %v2602_v15, %v1277_v26 }
 0x385   : > { %v1796_v36 = vpop.f32.mrf.mxu0 }
 0x386   : > { %v2606_v37 = vsel %vm1342_vm2, %v1286_v22, %v1358_v19  ;;  %vm1340_vm3 = vcmp.gt.f32.partialorder %v1278_v11, 0.0  ;;  %v1356_v12 = vmul.f32 0.2, %v1278_v11  ;;  %v1289_v40 = vadd.f32 %v1796_v36, %v2602_v15 }
 0x387   : > { %1390 = vst [vmem:[#allocation12 + $0x10] sm:$0xff] %v2606_v37  ;;  %v1280_v25 = vpop.f32.mrf.mxu0 }
 0x388   : > { %v2610_v42 = vsel %vm1340_vm3, %v1278_v11, %v1356_v12  ;;  %vm1343_vm4 = vcmp.gt.f32.partialorder %v1289_v40, 0.0  ;;  %v1359_v34 = vmul.f32 0.2, %v1289_v40  ;;  %v1281_v16 = vadd.f32 %v2602_v15, %v1280_v25 }
 0x389   : > { %1388 = vst [vmem:[#allocation12] sm:$0xff] %v2610_v42 }
 0x38a   : > { %v2614_v27 = vsel %vm1343_vm4, %v1289_v40, %v1359_v34  ;;  %vm1341_vm5 = vcmp.gt.f32.partialorder %v1281_v16, 0.0  ;;  %v1357_v38 = vmul.f32 0.2, %v1281_v16 }
 0x38b   : > { %1391 = vst [vmem:[#allocation12 + $0x18] sm:$0xff] %v2614_v27 }
 0x38c   : > { %v2617_v46 = vsel %vm1341_vm5, %v1281_v16, %v1357_v38 }
 0x38d   : > { %1389 = vst [vmem:[#allocation12 + $0x8] sm:$0xff] %v2617_v46 }
 0x391   : > { %v1799_v33 = vpop.f32.mrf.mxu0 }
 0x392   : > { %v1302_v43 = vadd.f32 %v1799_v33, %v2602_v15 }
 0x393   : > { %v1293_v41 = vpop.f32.mrf.mxu0 }
 0x394   : > { %vm1346_vm6 = vcmp.gt.f32.partialorder %v1302_v43, 0.0  ;;  %v1362_v45 = vmul.f32 0.2, %v1302_v43  ;;  %v1294_v31 = vadd.f32 %v2602_v15, %v1293_v41 }
 0x395   : > { %v1800_v47 = vpop.f32.mrf.mxu0 }
 0x396   : > { %v2622_v32 = vsel %vm1346_vm6, %v1302_v43, %v1362_v45  ;;  %vm1344_vm7 = vcmp.gt.f32.partialorder %v1294_v31, 0.0  ;;  %v1360_v48 = vmul.f32 0.2, %v1294_v31  ;;  %v1305_v49 = vadd.f32 %v1800_v47, %v2602_v15 }
 0x397   : > { %1394 = vst [vmem:[#allocation12 + $0x30] sm:$0xff] %v2622_v32  ;;  %v1296_v28 = vpop.f32.mrf.mxu0 }
 0x398   : > { %v2626_v18 = vsel %vm1344_vm7, %v1294_v31, %v1360_v48  ;;  %vm1347_vm8 = vcmp.gt.f32.partialorder %v1305_v49, 0.0  ;;  %v1363_v50 = vmul.f32 0.2, %v1305_v49  ;;  %v1297_v51 = vadd.f32 %v2602_v15, %v1296_v28 }
 0x399   : > { %1392 = vst [vmem:[#allocation12 + $0x20] sm:$0xff] %v2626_v18 }
 0x39a   : > { %v1379_v52 = vsel %vm1347_vm8, %v1305_v49, %v1363_v50  ;;  %vm1345_vm9 = vcmp.gt.f32.partialorder %v1297_v51, 0.0  ;;  %v1361_v39 = vmul.f32 0.2, %v1297_v51  ;;  %v1803_v35 = vpop.f32.mrf.mxu0 }
 0x39b   : > { %1395 = vst [vmem:[#allocation12 + $0x38] sm:$0xff] %v1379_v52  ;;  %v1318_v53 = vadd.f32 %v1803_v35, %v2602_v15 }
 0x39c   : > { %v1377_v54 = vsel %vm1345_vm9, %v1297_v51, %v1361_v39  ;;  %v1309_v58 = vpop.f32.mrf.mxu0 }
 0x39d   : > { %1393 = vst [vmem:[#allocation12 + $0x28] sm:$0xff] %v1377_v54  ;;  %vm1350_vm10 = vcmp.gt.f32.partialorder %v1318_v53, 0.0  ;;  %v1366_v57 = vmul.f32 0.2, %v1318_v53  ;;  %v1310_v59 = vadd.f32 %v2602_v15, %v1309_v58 }
 0x39e   : > { %v1804_v60 = vpop.f32.mrf.mxu0 }
 0x39f   : > { %v1382_v62 = vsel %vm1350_vm10, %v1318_v53, %v1366_v57  ;;  %vm1348_vm11 = vcmp.gt.f32.partialorder %v1310_v59, 0.0  ;;  %v1364_v63 = vmul.f32 0.2, %v1310_v59  ;;  %v1321_v0 = vadd.f32 %v1804_v60, %v2602_v15 }
 0x3a0   : > { %1398 = vst [vmem:[#allocation12 + $0x50] sm:$0xff] %v1382_v62  ;;  %v1312_v1 = vpop.f32.mrf.mxu0 }
 0x3a1   : > { %v1380_v56 = vsel %vm1348_vm11, %v1310_v59, %v1364_v63  ;;  %vm1351_vm12 = vcmp.gt.f32.partialorder %v1321_v0, 0.0  ;;  %v1367_v2 = vmul.f32 0.2, %v1321_v0  ;;  %v1313_v6 = vadd.f32 %v2602_v15, %v1312_v1 }
 0x3a2   : > { %1396 = vst [vmem:[#allocation12 + $0x40] sm:$0xff] %v1380_v56  ;;  %v1807_v7 = vpop.f32.mrf.mxu0 }
 0x3a3   : > { %v1383_v3 = vsel %vm1351_vm12, %v1321_v0, %v1367_v2  ;;  %vm1349_vm13 = vcmp.gt.f32.partialorder %v1313_v6, 0.0  ;;  %v1365_v13 = vmul.f32 0.2, %v1313_v6  ;;  %v1334_v55 = vadd.f32 %v1807_v7, %v2602_v15 }
 0x3a4   : > { %1399 = vst [vmem:[#allocation12 + $0x58] sm:$0xff] %v1383_v3  ;;  %v1325_v44 = vpop.f32.mrf.mxu0 }
 0x3a5   : > { %v1381_v5 = vsel %vm1349_vm13, %v1313_v6, %v1365_v13  ;;  %vm1354_vm14 = vcmp.gt.f32.partialorder %v1334_v55, 0.0  ;;  %v1370_v17 = vmul.f32 0.2, %v1334_v55  ;;  %v1326_v21 = vadd.f32 %v2602_v15, %v1325_v44 }
 0x3a6   : > { %1397 = vst [vmem:[#allocation12 + $0x48] sm:$0xff] %v1381_v5  ;;  %v1808_v20 = vpop.f32.mrf.mxu0 }
 0x3a7   : > { %v1386_v61 = vsel %vm1354_vm14, %v1334_v55, %v1370_v17  ;;  %vm1352_vm15 = vcmp.gt.f32.partialorder %v1326_v21, 0.0  ;;  %v1368_v23 = vmul.f32 0.2, %v1326_v21  ;;  %v1337_v14 = vadd.f32 %v1808_v20, %v2602_v15 }
 0x3a8   : > { %1402 = vst [vmem:[#allocation12 + $0x70] sm:$0xff] %v1386_v61  ;;  %v1328_v4 = vpop.f32.mrf.mxu0 }
 0x3a9   : > { %v1384_v8 = vsel %vm1352_vm15, %v1326_v21, %v1368_v23  ;;  %vm1355_vm0 = vcmp.gt.f32.partialorder %v1337_v14, 0.0  ;;  %v1371_v29 = vmul.f32 0.2, %v1337_v14  ;;  %v1329_v30 = vadd.f32 %v2602_v15, %v1328_v4 }
 0x3aa   : > { %1400 = vst [vmem:[#allocation12 + $0x60] sm:$0xff] %v1384_v8  ;;  %1407 = sbr.rel (%p1592_p7) target bundleno = 951 (0x3b7), region = 64 }
 0x3ab   : > { %v1387_v10 = vsel %vm1355_vm0, %v1337_v14, %v1371_v29  ;;  %vm1353_vm1 = vcmp.gt.f32.partialorder %v1329_v30, 0.0  ;;  %v1369_v24 = vmul.f32 0.2, %v1329_v30 }
 0x3ac   : > { %1403 = vst [vmem:[#allocation12 + $0x78] sm:$0xff] %v1387_v10 }
 0x3ad   : > { %v1385_v9 = vsel %vm1353_vm1, %v1329_v30, %v1369_v24 }
 0x3ae   : > { %1401 = vst [vmem:[#allocation12 + $0x68] sm:$0xff] %v1385_v9 }
 0x3af   : > { %1409 = vst [vmem:[#allocation2 + $0x30] sm:$0xff] %v2610_v42  ;;  %1410 = vst [vmem:[#allocation2] sm:$0xff] %v2617_v46 }
 0x3b0   : > { %1411 = vst [vmem:[#allocation2 + $0x58] sm:$0xff] %v2606_v37  ;;  %1412 = vst [vmem:[#allocation2 + $0x18] sm:$0xff] %v2614_v27 }
 0x3b1   : > { %1413 = vst [vmem:[#allocation2 + $0x50] sm:$0xff] %v2626_v18  ;;  %1414 = vst [vmem:[#allocation2 + $0x68] sm:$0xff] %v1377_v54 }
 0x3b2   : > { %1415 = vst [vmem:[#allocation2 + $0x8] sm:$0xff] %v2622_v32  ;;  %1416 = vst [vmem:[#allocation2 + $0x48] sm:$0xff] %v1379_v52 }
 0x3b3   : > { %1417 = vst [vmem:[#allocation2 + $0x40] sm:$0xff] %v1380_v56  ;;  %1418 = vst [vmem:[#allocation2 + $0x20] sm:$0xff] %v1381_v5 }
 0x3b4   : > { %1419 = vst [vmem:[#allocation2 + $0x10] sm:$0xff] %v1382_v62  ;;  %1420 = vst [vmem:[#allocation2 + $0x38] sm:$0xff] %v1383_v3 }
 0x3b5   : > { %1421 = vst [vmem:[#allocation2 + $0x60] sm:$0xff] %v1384_v8  ;;  %1422 = vst [vmem:[#allocation2 + $0x70] sm:$0xff] %v1385_v9 }
 0x3b6   : > { %1423 = vst [vmem:[#allocation2 + $0x78] sm:$0xff] %v1386_v61  ;;  %1424 = vst [vmem:[#allocation2 + $0x28] sm:$0xff] %v1387_v10 }
 0x3b7 PF: > { %p1839_p9 = scmp.eq.s32.totalorder %s2223_s24, 1  ;;  %s2161_s21 = smov [#allocation12]  }
 0x3b8   : > { %s1434_s28 = sshll.u32 %s2161_s21, 4  ;;  %s1435_s28 = int_to_ptr.vmem [resolvable:$true] %s1434_s28 }
 0x3b9   : > { %s2063_s17 = scalar_lea.vmem %s1435_s28, 2048  ;;  %p2070_p1 = scmp.lt.s32.totalorder %s1435_s28, %s1435_s28 }
 0x3ba   : > { %p2064_p5 = scmp.ne.s32.totalorder %s1435_s28, %s2063_s17  ;;  %p2071_p3 = scmp.lt.s32.totalorder %s2063_s17, %s2063_s17 }
 0x3bc   : > { %p2065_p11 = pnand %p2064_p5, %p1839_p9  ;;  %p2072_p2 = por %p2071_p3, %p2070_p1 }
 0x3be   : > { %p2066_p0 = pneg %p2065_p11 }
 0x3c0   : > { %p2073_p4 = pnand %p2072_p2, %p2066_p0 }
 0x3c2   : > { %2076 = shalt.err (!%p2073_p4)
}
 0x3c3   : > { %s2162_s30 = smov 128   ;;  %s2163_s18 = smov 8  }
 0x3c4   : > { %1820 = dma.vmem_to_hbm [thread:$0]  (%p1839_p9), %s1435_s28, 2048, %s2680_s5, [#allocation8], %s2162_s30, %s2162_s30, %s2163_s18  }
 0x3c5   : > { %2124 = dma.done.wait (%p1839_p9), [#allocation8], 2048  }
 0x3c6   : > { %2126 = vsyncadd (%p1839_p9), [#allocation8], 4294965248 }
 0x3c7 PF: > { %s18_s23 = sadd.s32 1, %s2149_s23   ;;  %s2690_s18 = smov %s2133_s19 }
 0x3c8   : > { %p15_p13 = scmp.ge.s32.totalorder %s18_s23, 4   ;;  %s2691_s19 = smov %s2137_s20 }
 0x3c9   : > { %s2692_s20 = smov %s2286_s7  ;;  %s2693_s21 = smov %s2145_s22 }
 0x3ca   : > { %s2694_s22 = smov %s2696_s16  ;;  %17 = sbr.rel (!%p15_p13) target bundleno = 5 (0x5), region = 106 }
 0x3cf   :  { %1450 = vsyncpa [#allocation7], 1 }
 0x3d0   :  { %1452 = vsyncpa [#allocation7 + $0x1], 1 }
 0x3d1   :  { %1453 = vsyncpa [#allocation10], 1 }
 0x3d2   :  { %1454 = vsyncpa [#allocation8], 1 }
 0x3d3   :  { %1456 = vsyncpa [#allocation8 + $0x1], 1 }

</bundles_post_ra>
